<compile_context>
chip_gen: v7x
topology: tpu7x:2x2x1
jax: 0.10.0
libtpu: 0.0.40
codegen_flags: <defaults>
</compile_context>

<pallas_src>
import functools
import math

import jax
import jax.numpy as jnp
from jax.experimental import pallas as pl
from jax.experimental.pallas import tpu as pltpu

# Scoped-VMEM budget: above the v5e/v6e defaults, below v7x's 64 MiB physical cap (headroom for
# compiler scratch / semaphores / double buffers). Raise toward ~96-112 MiB on v5e/v6e if adopting
# larger tiles there.
_VMEM_LIMIT_BYTES = 56 * 1024 * 1024
_MASK_VALUE = -1e30


# --------------------------- kernel 1: RMSNorm + fused QKV projection ---------------------------
def _qkv_kernel(x_ref, g1_ref, wqkv_ref, q_ref, k_ref, v_ref, *, num_heads, eps, scale):
    x = x_ref[0]                                      # (ts, D), input dtype (bf16 in demo)
    ts, d = x.shape
    hd = d // num_heads

    # RMSNorm statistics in f32; normalized activations cast back for the MXU.
    xf = x.astype(jnp.float32)
    ms = jnp.mean(xf * xf, axis=-1, keepdims=True)
    h = (xf * jax.lax.rsqrt(ms + eps) * g1_ref[...].astype(jnp.float32)).astype(wqkv_ref.dtype)

    # One wide matmul against the concatenated (D, 3D) QKV weight (bf16 x bf16 -> f32 acc).
    y = jnp.dot(h, wqkv_ref[...], preferred_element_type=jnp.float32)   # (ts, 3D) f32

    # Static per-head lane slices (hd is a multiple of 128 -> lane-aligned, no relayout copies).
    for hh in range(num_heads):
        lo = hh * hd
        q_ref[0, hh] = (y[:, lo:lo + hd] * scale).astype(q_ref.dtype)       # fold 1/sqrt(hd) once
        k_ref[0, hh] = y[:, d + lo:d + lo + hd].astype(k_ref.dtype)
        v_ref[0, hh] = y[:, 2 * d + lo:2 * d + lo + hd].astype(v_ref.dtype)


# ---------------------- kernel 2: causal flash attention + fused out-proj ----------------------
def _flash_attn_kernel(q_ref, k_ref, v_ref, wo_ref, o_ref, m_sc, l_sc, acc_sc):
    qi = pl.program_id(1)
    ki = pl.program_id(2)
    _, num_heads, tq, hd = q_ref.shape
    tk = k_ref.shape[2]

    @pl.when(ki == 0)
    def _init():
        m_sc[...] = jnp.full(m_sc.shape, -jnp.inf, jnp.float32)
        l_sc[...] = jnp.zeros(l_sc.shape, jnp.float32)
        acc_sc[...] = jnp.zeros(acc_sc.shape, jnp.float32)

    q_start = qi * tq
    k_start = ki * tk
    # Block-level causal structure: KV tiles fully above the diagonal are skipped (and, thanks to
    # the clamped index_map, never DMA'd); only diagonal-straddling tiles get an element mask.
    needed = k_start <= q_start + (tq - 1)
    fully_visible = k_start + (tk - 1) <= q_start

    def process(apply_mask):
        q = q_ref[0]                                  # (H, tq, hd)
        k = k_ref[0]                                  # (H, tk, hd)
        s = jnp.einsum("hqd,hkd->hqk", q, k,
                       preferred_element_type=jnp.float32)          # (H, tq, tk) f32 scores
        if apply_mask:                                # only on diagonal blocks
            qpos = q_start + jax.lax.broadcasted_iota(jnp.int32, (tq, tk), 0)
            kpos = k_start + jax.lax.broadcasted_iota(jnp.int32, (tq, tk), 1)
            s = jnp.where((kpos <= qpos)[None], s, _MASK_VALUE)

        m_prev = m_sc[...]                            # (H, tq, 1) f32
        m_new = jnp.maximum(m_prev, jnp.max(s, axis=-1, keepdims=True))
        alpha = jnp.exp(m_prev - m_new)
        p = jnp.exp(s - m_new)                        # f32 softmax statistics
        l_sc[...] = alpha * l_sc[...] + jnp.sum(p, axis=-1, keepdims=True)
        acc_sc[...] = alpha * acc_sc[...] + jnp.einsum(
            "hqk,hkd->hqd", p.astype(v_ref.dtype), v_ref[0],         # p in bf16 for the MXU
            preferred_element_type=jnp.float32)
        m_sc[...] = m_new

    @pl.when(jnp.logical_and(needed, fully_visible))
    def _unmasked():
        process(apply_mask=False)

    @pl.when(jnp.logical_and(needed, jnp.logical_not(fully_visible)))
    def _masked():
        process(apply_mask=True)

    @pl.when(ki == pl.num_programs(2) - 1)
    def _finalize():
        inv_l = pl.reciprocal(l_sc[...], approx=True)                # EUP reciprocal
        ctx = (acc_sc[...] * inv_l).astype(wo_ref.dtype)             # (H, tq, hd) bf16
        # Fused output projection: per-head (tq,hd)x(hd,D) MXU matmuls, summed over heads.
        proj = jnp.einsum("hqd,hdk->hqk", ctx, wo_ref[...],
                          preferred_element_type=jnp.float32)        # (H, tq, D) f32
        o_ref[0] = jnp.sum(proj, axis=0).astype(o_ref.dtype)         # (tq, D)


# ------------- kernel 3: residual + RMSNorm + GELU FFN (F-tiled reduction) + residual -------------
def _ffn_kernel(x_ref, attn_ref, g2_ref, w1_ref, w2_ref, o_ref, x1_sc, h2_sc, acc_sc, *, eps):
    kf = pl.program_id(2)

    @pl.when(kf == 0)
    def _prologue():
        x1 = x_ref[0].astype(jnp.float32) + attn_ref[0].astype(jnp.float32)   # residual (eval drop)
        x1_sc[...] = x1
        ms = jnp.mean(x1 * x1, axis=-1, keepdims=True)
        h2_sc[...] = (x1 * jax.lax.rsqrt(ms + eps)
                      * g2_ref[...].astype(jnp.float32)).astype(h2_sc.dtype)
        acc_sc[...] = jnp.zeros(acc_sc.shape, jnp.float32)

    # One F tile of the FFN: (ts, D) x (D, tf) -> GELU -> (ts, tf) x (tf, D), accumulated in f32.
    u = jnp.dot(h2_sc[...], w1_ref[...], preferred_element_type=jnp.float32)  # (ts, tf)
    c = math.sqrt(2.0 / math.pi)                                              # tanh-approx GELU
    u = 0.5 * u * (1.0 + jnp.tanh(c * (u + 0.044715 * u * u * u)))
    acc_sc[...] += jnp.dot(u.astype(w2_ref.dtype), w2_ref[...],
                           preferred_element_type=jnp.float32)

    @pl.when(kf == pl.num_programs(2) - 1)
    def _epilogue():
        o_ref[0] = (x1_sc[...] + acc_sc[...]).astype(o_ref.dtype)


# --------------------------------------- wrapper ---------------------------------------
def transformer_block(x, params, *, num_heads, eps=1e-5,
                      seq_tile=256, kv_tile=256, ff_tile=None):
    B, S, D = x.shape
    F = params["w1"].shape[1]
    assert D % num_heads == 0
    hd = D // num_heads
    # Per-head lane slicing / (B,H,S,hd) layout is only lane-clean when hd % 128 == 0.
    assert hd % 128 == 0, "head_dim must be a multiple of 128 (pack heads or keep (B,S,D) layout)"
    ts = min(seq_tile, S)
    tq = min(seq_tile, S)
    tk = min(kv_tile, S)
    tf = min(ff_tile if ff_tile is not None else 2048, F)
    assert S % ts == 0 and S % tq == 0 and S % tk == 0 and F % tf == 0
    dt = x.dtype

    # Weight prep (layout only): fused QKV weight and head-major reshaped wo.
    wqkv = jnp.concatenate([params["wq"], params["wk"], params["wv"]], axis=1)   # (D, 3D)
    wo_h = params["wo"].reshape(num_heads, hd, D)                                # (H, hd, D)

    def rep_spec(shape):
        # Whole weight / gain, constant block index -> DMA'd into VMEM once for the whole grid.
        return pl.BlockSpec(shape, lambda *_: (0,) * len(shape))

    def cparams(sem):
        return pltpu.CompilerParams(dimension_semantics=sem,
                                    vmem_limit_bytes=_VMEM_LIMIT_BYTES)

    # ---- 1) RMSNorm + fused QKV projection (heads split out, q pre-scaled) ----
    q, k, v = pl.pallas_call(
        functools.partial(_qkv_kernel, num_heads=num_heads, eps=eps,
                          scale=1.0 / math.sqrt(hd)),
        grid=(B, S // ts),
        in_specs=[
            pl.BlockSpec((1, ts, D), lambda b, i: (b, i, 0)),     # x tile
            rep_spec((1, D)),                                     # ln1 gain
            rep_spec((D, 3 * D)),                                 # fused wqkv (bf16)
        ],
        out_specs=[pl.BlockSpec((1, num_heads, ts, hd), lambda b, i: (b, 0, i, 0))] * 3,
        out_shape=[jax.ShapeDtypeStruct((B, num_heads, S, hd), dt)] * 3,
        compiler_params=cparams(("parallel", "parallel")),
    )(x, params["g1"], wqkv)

    # ---- 2) causal flash attention + fused output projection ----
    # K/V index maps clamp to the last causally-needed block: skipped tiles are never DMA'd.
    def kv_index_map(b, qi, ki):
        last_needed = ((qi + 1) * tq - 1) // tk
        return (b, 0, jnp.minimum(ki, last_needed), 0)

    attn = pl.pallas_call(
        _flash_attn_kernel,
        grid=(B, S // tq, S // tk),
        in_specs=[
            pl.BlockSpec((1, num_heads, tq, hd), lambda b, qi, ki: (b, 0, qi, 0)),
            pl.BlockSpec((1, num_heads, tk, hd), kv_index_map),
            pl.BlockSpec((1, num_heads, tk, hd), kv_index_map),
            rep_spec((num_heads, hd, D)),                         # wo, head-major
        ],
        out_specs=pl.BlockSpec((1, tq, D), lambda b, qi, ki: (b, qi, 0)),
        out_shape=jax.ShapeDtypeStruct((B, S, D), dt),
        scratch_shapes=[
            pltpu.VMEM((num_heads, tq, 1), jnp.float32),          # running max
            pltpu.VMEM((num_heads, tq, 1), jnp.float32),          # running denominator
            pltpu.VMEM((num_heads, tq, hd), jnp.float32),         # f32 output accumulator
        ],
        compiler_params=cparams(("parallel", "parallel", "arbitrary")),
    )(q, k, v, wo_h)

    # ---- 3) residual + RMSNorm + GELU FFN (F-tiled reduction) + residual ----
    out = pl.pallas_call(
        functools.partial(_ffn_kernel, eps=eps),
        grid=(B, S // ts, F // tf),
        in_specs=[
            pl.BlockSpec((1, ts, D), lambda b, i, kf: (b, i, 0)),   # original x (residual)
            pl.BlockSpec((1, ts, D), lambda b, i, kf: (b, i, 0)),   # projected attention output
            rep_spec((1, D)),                                       # ln2 gain
            pl.BlockSpec((D, tf), lambda b, i, kf: (0, kf)),        # ffn w1 column tile
            pl.BlockSpec((tf, D), lambda b, i, kf: (kf, 0)),        # ffn w2 row tile
        ],
        out_specs=pl.BlockSpec((1, ts, D), lambda b, i, kf: (b, i, 0)),
        out_shape=jax.ShapeDtypeStruct((B, S, D), dt),
        scratch_shapes=[
            pltpu.VMEM((ts, D), jnp.float32),                       # x1 residual (f32)
            pltpu.VMEM((ts, D), dt),                                # normalized activations
            pltpu.VMEM((ts, D), jnp.float32),                       # FFN f32 accumulator
        ],
        compiler_params=cparams(("parallel", "parallel", "arbitrary")),
    )(x, attn, params["g2"], params["w1"], params["w2"])
    return out


# --------------------------------------- reference ---------------------------------------
def reference_block(x, params, *, num_heads, eps=1e-5):
    """Pure-JAX f32 reference mirroring the PyTorch forward (eval mode)."""
    B, S, D = x.shape
    hd = D // num_heads

    def rmsnorm(v, g):
        return v * jax.lax.rsqrt(jnp.mean(v * v, -1, keepdims=True) + eps) * g

    h = rmsnorm(x, params["g1"])
    q = h @ params["wq"]
    k = h @ params["wk"]
    v = h @ params["wv"]
    q = q.reshape(B, S, num_heads, hd).transpose(0, 2, 1, 3)
    k = k.reshape(B, S, num_heads, hd).transpose(0, 2, 1, 3)
    v = v.reshape(B, S, num_heads, hd).transpose(0, 2, 1, 3)
    scores = (q @ k.transpose(0, 1, 3, 2)) / math.sqrt(hd)
    mask = jnp.tril(jnp.ones((S, S), bool))
    scores = jnp.where(mask, scores, _MASK_VALUE)
    p = jax.nn.softmax(scores, axis=-1)
    attn = (p @ v).transpose(0, 2, 1, 3).reshape(B, S, D) @ params["wo"]
    x1 = x + attn

    h2 = rmsnorm(x1, params["g2"])
    u = h2 @ params["w1"]
    c = math.sqrt(2.0 / math.pi)
    u = 0.5 * u * (1.0 + jnp.tanh(c * (u + 0.044715 * u ** 3)))
    return x1 + u @ params["w2"]


if __name__ == "__main__":
    # small demo config: head_dim = D // H = 128, 256-wide tiles, 2x2 causal attention grid,
    # 2 F-tiles in the FFN reduction (exercises the causal DMA clamp and the F accumulation).
    B, S, D, H, F = 2, 512, 256, 2, 1024
    dt = jnp.bfloat16

    key = jax.random.PRNGKey(0)
    ks = jax.random.split(key, 8)

    def init(k, shape, fan_in):
        return (jax.random.normal(k, shape, jnp.float32) / math.sqrt(fan_in)).astype(dt)

    params = {
        "g1": jnp.ones((1, D), dt),
        "wq": init(ks[0], (D, D), D),
        "wk": init(ks[1], (D, D), D),
        "wv": init(ks[2], (D, D), D),
        "wo": init(ks[3], (D, D), D),
        "g2": jnp.ones((1, D), dt),
        "w1": init(ks[4], (D, F), D),
        "w2": init(ks[5], (F, D), F),
    }
    x = jax.random.normal(ks[6], (B, S, D), jnp.float32).astype(dt)

    out = transformer_block(x, params, num_heads=H, seq_tile=256, kv_tile=256, ff_tile=512)
    out = jax.block_until_ready(out)

    # f32 reference computed from the same bf16-valued inputs
    params32 = {k_: v.astype(jnp.float32) for k_, v in params.items()}
    ref = reference_block(x.astype(jnp.float32), params32, num_heads=H)

    out32 = out.astype(jnp.float32)
    rel_err = float(jnp.linalg.norm(out32 - ref) / jnp.linalg.norm(ref))

    assert out.shape == (B, S, D)
    assert out.dtype == dt
    # bf16 operands with f32 accumulation: expect well under 1% relative L2 error
    assert rel_err < 3e-2, f"relative error too large: {rel_err}"

    print("KERNEL_OK")
</pallas_src>

<mosaic_0001>
module attributes {stable_mosaic.version = 11 : i64} {
  func.func @_qkv_kernel(%arg0: i32, %arg1: i32, %arg2: memref<1x256x256xbf16, #tpu.memory_space<vmem>>, %arg3: memref<1x256xbf16, #tpu.memory_space<vmem>>, %arg4: memref<256x768xbf16, #tpu.memory_space<vmem>>, %arg5: memref<1x2x256x128xbf16, #tpu.memory_space<vmem>>, %arg6: memref<1x2x256x128xbf16, #tpu.memory_space<vmem>>, %arg7: memref<1x2x256x128xbf16, #tpu.memory_space<vmem>>) attributes {dimension_semantics = [#tpu.dimension_semantics<parallel>, #tpu.dimension_semantics<parallel>], iteration_bounds = array<i64: 2, 2>, scalar_prefetch = 0 : i64, scratch_operands = 0 : i64, tpu.core_type = #tpu.core_type<tc>, window_params = [{transform_indices = @transform_0, window_bounds = array<i64: 1, 256, 256>}, {pipeline_mode = #tpu.pipeline_mode<synchronous>, transform_indices = @transform_1, window_bounds = array<i64: 1, 256>}, {pipeline_mode = #tpu.pipeline_mode<synchronous>, transform_indices = @transform_2, window_bounds = array<i64: 256, 768>}, {transform_indices = @transform_3, window_bounds = array<i64: 1, 2, 256, 128>}, {transform_indices = @transform_4, window_bounds = array<i64: 1, 2, 256, 128>}, {transform_indices = @transform_5, window_bounds = array<i64: 1, 2, 256, 128>}]} {
    %c0 = arith.constant 0 : index
    %c0_0 = arith.constant 0 : index
    %c0_1 = arith.constant 0 : index
    %0 = vector.load %arg2[%c0, %c0_0, %c0_1] : memref<1x256x256xbf16, #tpu.memory_space<vmem>>, vector<1x256x256xbf16>
    %1 = vector.shape_cast %0 : vector<1x256x256xbf16> to vector<256x256xbf16>
    %2 = arith.extf %1 : vector<256x256xbf16> to vector<256x256xf32>
    %3 = arith.mulf %2, %2 : vector<256x256xf32>
    %cst = arith.constant dense<0.000000e+00> : vector<256xf32>
    %4 = vector.multi_reduction <add>, %3, %cst [1] : vector<256x256xf32> to vector<256xf32>
    %5 = vector.shape_cast %4 : vector<256xf32> to vector<256x1xf32>
    %cst_2 = arith.constant 2.560000e+02 : f32
    %6 = vector.broadcast %cst_2 : f32 to vector<256x1xf32>
    %7 = arith.divf %5, %6 : vector<256x1xf32>
    %cst_3 = arith.constant 9.99999974E-6 : f32
    %8 = vector.broadcast %cst_3 : f32 to vector<256x1xf32>
    %9 = arith.addf %7, %8 : vector<256x1xf32>
    %10 = math.rsqrt %9 : vector<256x1xf32>
    %11 = vector.broadcast %10 : vector<256x1xf32> to vector<256x256xf32>
    %12 = arith.mulf %2, %11 : vector<256x256xf32>
    %c0_4 = arith.constant 0 : index
    %c0_5 = arith.constant 0 : index
    %13 = vector.load %arg3[%c0_4, %c0_5] : memref<1x256xbf16, #tpu.memory_space<vmem>>, vector<1x256xbf16>
    %14 = arith.extf %13 : vector<1x256xbf16> to vector<1x256xf32>
    %15 = vector.broadcast %14 : vector<1x256xf32> to vector<256x256xf32>
    %16 = arith.mulf %12, %15 : vector<256x256xf32>
    %17 = arith.truncf %16 : vector<256x256xf32> to vector<256x256xbf16>
    %c0_6 = arith.constant 0 : index
    %c0_7 = arith.constant 0 : index
    %18 = vector.load %arg4[%c0_6, %c0_7] : memref<256x768xbf16, #tpu.memory_space<vmem>>, vector<256x768xbf16>
    %cst_8 = arith.constant dense<0.000000e+00> : vector<256x768xf32>
    %19 = tpu.matmul %17, %18, %cst_8 {dimension_numbers = #tpu.dot_dimension_numbers<[1], [0], [0], [1], [0, 0, 1, 1], [], []>} : vector<256x256xbf16>, vector<256x768xbf16>, vector<256x768xf32> -> vector<256x768xf32>
    %20 = vector.extract_strided_slice %19 {offsets = [0, 0], sizes = [256, 128], strides = [1, 1]} : vector<256x768xf32> to vector<256x128xf32>
    %cst_9 = arith.constant 0.0883883461 : f32
    %21 = vector.broadcast %cst_9 : f32 to vector<256x128xf32>
    %22 = arith.mulf %20, %21 : vector<256x128xf32>
    %23 = arith.truncf %22 : vector<256x128xf32> to vector<256x128xbf16>
    %c0_10 = arith.constant 0 : index
    %c0_11 = arith.constant 0 : index
    %c0_12 = arith.constant 0 : index
    %c0_13 = arith.constant 0 : index
    %24 = vector.load %arg5[%c0_10, %c0_11, %c0_12, %c0_13] : memref<1x2x256x128xbf16, #tpu.memory_space<vmem>>, vector<1x1x256x128xbf16>
    %25 = vector.shape_cast %24 : vector<1x1x256x128xbf16> to vector<256x128xbf16>
    %26 = vector.shape_cast %23 : vector<256x128xbf16> to vector<1x1x256x128xbf16>
    tpu.vector_store %arg5[%c0_10, %c0_11, %c0_12, %c0_13], %26 {strides = array<i32>} : memref<1x2x256x128xbf16, #tpu.memory_space<vmem>>, vector<1x1x256x128xbf16>,
    %27 = vector.extract_strided_slice %19 {offsets = [0, 256], sizes = [256, 128], strides = [1, 1]} : vector<256x768xf32> to vector<256x128xf32>
    %28 = arith.truncf %27 : vector<256x128xf32> to vector<256x128xbf16>
    %c0_14 = arith.constant 0 : index
    %c0_15 = arith.constant 0 : index
    %c0_16 = arith.constant 0 : index
    %c0_17 = arith.constant 0 : index
    %29 = vector.load %arg6[%c0_14, %c0_15, %c0_16, %c0_17] : memref<1x2x256x128xbf16, #tpu.memory_space<vmem>>, vector<1x1x256x128xbf16>
    %30 = vector.shape_cast %29 : vector<1x1x256x128xbf16> to vector<256x128xbf16>
    %31 = vector.shape_cast %28 : vector<256x128xbf16> to vector<1x1x256x128xbf16>
    tpu.vector_store %arg6[%c0_14, %c0_15, %c0_16, %c0_17], %31 {strides = array<i32>} : memref<1x2x256x128xbf16, #tpu.memory_space<vmem>>, vector<1x1x256x128xbf16>,
    %32 = vector.extract_strided_slice %19 {offsets = [0, 512], sizes = [256, 128], strides = [1, 1]} : vector<256x768xf32> to vector<256x128xf32>
    %33 = arith.truncf %32 : vector<256x128xf32> to vector<256x128xbf16>
    %c0_18 = arith.constant 0 : index
    %c0_19 = arith.constant 0 : index
    %c0_20 = arith.constant 0 : index
    %c0_21 = arith.constant 0 : index
    %34 = vector.load %arg7[%c0_18, %c0_19, %c0_20, %c0_21] : memref<1x2x256x128xbf16, #tpu.memory_space<vmem>>, vector<1x1x256x128xbf16>
    %35 = vector.shape_cast %34 : vector<1x1x256x128xbf16> to vector<256x128xbf16>
    %36 = vector.shape_cast %33 : vector<256x128xbf16> to vector<1x1x256x128xbf16>
    tpu.vector_store %arg7[%c0_18, %c0_19, %c0_20, %c0_21], %36 {strides = array<i32>} : memref<1x2x256x128xbf16, #tpu.memory_space<vmem>>, vector<1x1x256x128xbf16>,
    %37 = vector.extract_strided_slice %19 {offsets = [0, 128], sizes = [256, 128], strides = [1, 1]} : vector<256x768xf32> to vector<256x128xf32>
    %cst_22 = arith.constant 0.0883883461 : f32
    %38 = vector.broadcast %cst_22 : f32 to vector<256x128xf32>
    %39 = arith.mulf %37, %38 : vector<256x128xf32>
    %40 = arith.truncf %39 : vector<256x128xf32> to vector<256x128xbf16>
    %c0_23 = arith.constant 0 : index
    %c1 = arith.constant 1 : index
    %c0_24 = arith.constant 0 : index
    %c0_25 = arith.constant 0 : index
    %41 = vector.load %arg5[%c0_23, %c1, %c0_24, %c0_25] : memref<1x2x256x128xbf16, #tpu.memory_space<vmem>>, vector<1x1x256x128xbf16>
    %42 = vector.shape_cast %41 : vector<1x1x256x128xbf16> to vector<256x128xbf16>
    %43 = vector.shape_cast %40 : vector<256x128xbf16> to vector<1x1x256x128xbf16>
    tpu.vector_store %arg5[%c0_23, %c1, %c0_24, %c0_25], %43 {strides = array<i32>} : memref<1x2x256x128xbf16, #tpu.memory_space<vmem>>, vector<1x1x256x128xbf16>,
    %44 = vector.extract_strided_slice %19 {offsets = [0, 384], sizes = [256, 128], strides = [1, 1]} : vector<256x768xf32> to vector<256x128xf32>
    %45 = arith.truncf %44 : vector<256x128xf32> to vector<256x128xbf16>
    %c0_26 = arith.constant 0 : index
    %c1_27 = arith.constant 1 : index
    %c0_28 = arith.constant 0 : index
    %c0_29 = arith.constant 0 : index
    %46 = vector.load %arg6[%c0_26, %c1_27, %c0_28, %c0_29] : memref<1x2x256x128xbf16, #tpu.memory_space<vmem>>, vector<1x1x256x128xbf16>
    %47 = vector.shape_cast %46 : vector<1x1x256x128xbf16> to vector<256x128xbf16>
    %48 = vector.shape_cast %45 : vector<256x128xbf16> to vector<1x1x256x128xbf16>
    tpu.vector_store %arg6[%c0_26, %c1_27, %c0_28, %c0_29], %48 {strides = array<i32>} : memref<1x2x256x128xbf16, #tpu.memory_space<vmem>>, vector<1x1x256x128xbf16>,
    %49 = vector.extract_strided_slice %19 {offsets = [0, 640], sizes = [256, 128], strides = [1, 1]} : vector<256x768xf32> to vector<256x128xf32>
    %50 = arith.truncf %49 : vector<256x128xf32> to vector<256x128xbf16>
    %c0_30 = arith.constant 0 : index
    %c1_31 = arith.constant 1 : index
    %c0_32 = arith.constant 0 : index
    %c0_33 = arith.constant 0 : index
    %51 = vector.load %arg7[%c0_30, %c1_31, %c0_32, %c0_33] : memref<1x2x256x128xbf16, #tpu.memory_space<vmem>>, vector<1x1x256x128xbf16>
    %52 = vector.shape_cast %51 : vector<1x1x256x128xbf16> to vector<256x128xbf16>
    %53 = vector.shape_cast %50 : vector<256x128xbf16> to vector<1x1x256x128xbf16>
    tpu.vector_store %arg7[%c0_30, %c1_31, %c0_32, %c0_33], %53 {strides = array<i32>} : memref<1x2x256x128xbf16, #tpu.memory_space<vmem>>, vector<1x1x256x128xbf16>,
    return
  }
  func.func @transform_0(%arg0: i32, %arg1: i32) -> (i32, i32, i32) {
    %c0_i32 = arith.constant 0 : i32
    %c0_i32_0 = arith.constant 0 : i32
    return %arg0, %arg1, %c0_i32 : i32, i32, i32
  }
  func.func @transform_1(%arg0: i32, %arg1: i32) -> (i32, i32) {
    %c0_i32 = arith.constant 0 : i32
    %c0_i32_0 = arith.constant 0 : i32
    %c0_i32_1 = arith.constant 0 : i32
    return %c0_i32, %c0_i32_0 : i32, i32
  }
  func.func @transform_2(%arg0: i32, %arg1: i32) -> (i32, i32) {
    %c0_i32 = arith.constant 0 : i32
    %c0_i32_0 = arith.constant 0 : i32
    %c0_i32_1 = arith.constant 0 : i32
    return %c0_i32, %c0_i32_0 : i32, i32
  }
  func.func @transform_3(%arg0: i32, %arg1: i32) -> (i32, i32, i32, i32) {
    %c0_i32 = arith.constant 0 : i32
    %c0_i32_0 = arith.constant 0 : i32
    %c0_i32_1 = arith.constant 0 : i32
    return %arg0, %c0_i32, %arg1, %c0_i32_0 : i32, i32, i32, i32
  }
  func.func @transform_4(%arg0: i32, %arg1: i32) -> (i32, i32, i32, i32) {
    %c0_i32 = arith.constant 0 : i32
    %c0_i32_0 = arith.constant 0 : i32
    %c0_i32_1 = arith.constant 0 : i32
    return %arg0, %c0_i32, %arg1, %c0_i32_0 : i32, i32, i32, i32
  }
  func.func @transform_5(%arg0: i32, %arg1: i32) -> (i32, i32, i32, i32) {
    %c0_i32 = arith.constant 0 : i32
    %c0_i32_0 = arith.constant 0 : i32
    %c0_i32_1 = arith.constant 0 : i32
    return %arg0, %c0_i32, %arg1, %c0_i32_0 : i32, i32, i32, i32
  }
}

</mosaic_0001>

<bundles_post_ra>
// kernel: tpu_custom_call.1
= control target key start
LH: loop header
LB: loop body
LE: loop exit
PB: predicated region body
PF: predicated region fallthrough
CT: control target
= control target key end

     0   :  { %s6067_s0 = inlined_call_operand.hbm [shape: bf16[2,512,256], index: 0, kind: input, shape index: {}]   ;;  %s6068_s1 = inlined_call_operand.vmem [shape: bf16[1,256], index: 1, kind: input, shape index: {}]   ;;  %s6069_s2 = inlined_call_operand.hbm [shape: bf16[256,768], index: 2, kind: input, shape index: {}]   ;;  %s6070_s3 = inlined_call_operand.hbm [shape: bf16[2,2,512,128], index: 3, kind: output, shape index: {0}]   ;;  %s6071_s4 = inlined_call_operand.hbm [shape: bf16[2,2,512,128], index: 4, kind: output, shape index: {1}]   ;;  %s6072_s5 = inlined_call_operand.hbm [shape: bf16[2,2,512,128], index: 5, kind: output, shape index: {2}]  }
   0x1   :  { %6104 = sst [smem:[#allocation48_spill]] %s6069_s2 }
   0x2   :  { %6105 = sst [smem:[#allocation49_spill]] %s6072_s5 }
   0x3   :  { %11 = vsyncpa [#allocation3], 0 }
   0x4   :  { %13 = vsyncpa [#allocation3 + $0x1], 0 }
   0x5   :  { %14 = vsyncpa [#allocation6], 0 }
   0x6   :  { %15 = vsyncpa [#allocation4], 0 }
   0x7   :  { %17 = vsyncpa [#allocation4 + $0x1], 0 }
   0x8   :  { %18 = vsyncpa [#allocation9], 0 }
   0x9   :  { %20 = vsyncpa [#allocation9 + $0x1], 0  ;;  %s5092_s18 = smov 0   ;;  %s5094_s19 = smov 0  }
   0xa   :  { %s5096_s20 = smov 0   ;;  %s5098_s21 = smov 0  }
   0xb   :  { %s5100_s22 = smov 0   ;;  %s5102_s23 = smov 0  }
   0xc   :  { %s5104_s24 = smov 0   ;;  %s5106_s25 = smov 0  }
   0xd LB: > { %6106 = sst [smem:[#allocation21_spill]] %s5005_s18  ;;  %s5133_s26 = sadd.s32 4294967295, %s5033_s25   ;;  %s5033_s25 = sphi %s5106_s25, %s26_s25   ;;  %s5029_s24 = sphi %s5104_s24, %s6180_s24   ;;  %s5025_s23 = sphi %s5102_s23, %s6174_s23   ;;  %s5021_s22 = sphi %s5100_s22, %s6179_s22   ;;  %s5017_s21 = sphi %s5098_s21, %s6173_s21   ;;  %s5013_s20 = sphi %s5096_s20, %s6178_s20   ;;  %s5009_s19 = sphi %s5094_s19, %s6177_s19   ;;  %s5005_s18 = sphi %s5092_s18, %s6176_s18  }
   0xe   : > { %6107 = sst [smem:[#allocation22_spill]] %s5025_s23  ;;  %s6076_s27 = sadd.s32 4294967294, %s5033_s25  }
   0xf   : > { %p60_p0 = scmp.ne.s32.totalorder %s5009_s19, %s5005_s18  ;;  %p6073_p1 = scmp.eq.s32.totalorder %s5133_s26, 0 }
  0x10   : > { %p134_p3 = scmp.eq.s32.totalorder %s6076_s27, 3  ;;  %p3337_p5 = scmp.ge.s32.totalorder %s5033_s25, 1 }
  0x11   : > { %p5144_p4 = por %p6073_p1, %p60_p0  ;;  %p197_p7 = scmp.lt.s32.totalorder %s5033_s25, 5 }
  0x12   : > { %p5149_p6 = por %p134_p3, %p60_p0  ;;  %s5035_s6 = smov [#allocation5]  }
  0x13   : > { %s6108_s28 = scalar_select %p5144_p4, 1, 0 }
  0x14   : > { %s6109_s29 = scalar_select %p5149_p6, 1, 0 }
  0x15   : > { %p5154_p8 = pnand %p3337_p5, %p197_p7  ;;  %s212_s7 = sshll.u32 %s5035_s6, 4  ;;  %s213_s7 = int_to_ptr.vmem [resolvable:$true] %s212_s7 }
  0x16   : > { %6110 = sst [smem:[#allocation23_spill]] %s6109_s29  ;;  %s6113_s2 = sld [smem:[#allocation48_spill]] }
  0x17   : > { %s6111_s30 = scalar_select %p5154_p8, 1, 0 }
  0x18   : > { %p4577_p9 = pneg %p5154_p8 }
  0x1a   : > { %p5162_p10 = pnand %p4577_p9, %p6073_p1 }
  0x1c   : > { %s4897_s11 = scalar_lea.hbm %s6113_s2, 12288  ;;  %p4899_p12 = pneg %p5162_p10 }
  0x1d   : > { %p4898_p11 = scmp.ne.s32.totalorder %s6113_s2, %s4897_s11  ;;  %p4904_p3 = scmp.lt.u32.totalorder %s4897_s11, %s6113_s2 }
  0x1f   : > { %p4900_p13 = pnand %p4899_p12, %p4898_p11 }
  0x21   : > { %p4901_p0 = pneg %p4900_p13 }
  0x23   : > { %p4906_p5 = pnand %p4904_p3, %p4901_p0 }
  0x25   : > { %4909 = shalt.err (!%p4906_p5)
}
  0x26   : > { %s4910_s16 = scalar_lea.vmem %s213_s7, 12288  ;;  %p4918_p2 = scmp.lt.s32.totalorder %s213_s7, %s213_s7 }
  0x27   : > { %p4911_p7 = scmp.ne.s32.totalorder %s213_s7, %s4910_s16  ;;  %p4919_p6 = scmp.lt.s32.totalorder %s4910_s16, %s4910_s16 }
  0x29   : > { %p4913_p9 = pnand %p4911_p7, %p4899_p12  ;;  %p4920_p4 = por %p4919_p6, %p4918_p2 }
  0x2b   : > { %p4914_p1 = pneg %p4913_p9 }
  0x2d   : > { %p4921_p8 = pnand %p4920_p4, %p4914_p1 }
  0x2f   : > { %4924 = shalt.err (!%p4921_p8)
}
  0x30   : > { %s5036_s17 = smov 384   ;;  %s5037_s6 = smov 24  }
  0x31   : > { %4580 = dma.hbm_to_vmem [thread:$0]  (!%p5162_p10), %s6113_s2, 12288, %s213_s7, [#allocation6], %s5036_s17, %s5036_s17, %s5037_s6  }
  0x32   : > { %s35_s11 = sadd.s32 1, %s5025_s23  ;;  %s38_s12 = sadd.s32 1, %s5029_s24 }
  0x33   : > { %p36_p1 = scmp.ge.s32.totalorder %s35_s11, 2  ;;  %s47_s13 = sadd.s32 1, %s5013_s20 }
  0x34   : > { %p54_p2 = scmp.ne.s32.totalorder %s5013_s20, %s5009_s19  ;;  %p55_p4 = scmp.eq.s32.totalorder %s5033_s25, 0 }
  0x35   : > { %s6182_s11 = smov (%p36_p1, %s35_s11), 0  ;;  %s6184_s12 = smov (!%p36_p1, %s38_s12), %s5029_s24 }
  0x36   : > { %6114 = sst [smem:[#allocation24_spill]] %s6182_s11  ;;  %s43_s14 = ssub.s32 %s5025_s23, %s6182_s11 }
  0x37   : > { %p40_p6 = scmp.ge.s32.totalorder %s6184_s12, 2  ;;  %p6115_p8 = scmp.eq.s32.totalorder %s5133_s26, 3 }
  0x38   : > { %p5199_p10 = por %p55_p4, %p54_p2  ;;  %p4596_p12 = scmp.lt.s32.totalorder %s5033_s25, 4 }
  0x39   : > { %p5195_p11 = por %p6115_p8, %p54_p2  ;;  %s6186_s12 = smov (%p40_p6, %s6184_s12), 0 }
  0x3a   : > { %6118 = sst [smem:[#allocation25_spill]] %s6186_s12  ;;  %s226_s15 = sand.u32 1, %s5013_s20  }
  0x3b   : > { %s3749_s16 = sshll.u32 %s5025_s23, 6  ;;  %s42_s17 = ssub.s32 %s5029_s24, %s6186_s12 }
  0x3c   : > { %s44_s6 = sor.u32 %s43_s14, %s42_s17  ;;  %s3340_s9 = sshll.u32 %s226_s15, 8 }
  0x3d   : > { %p45_p13 = scmp.eq.s32.totalorder %s44_s6, 0  ;;  %s3343_s10 = sshll.u32 %s5029_s24, 7 }
  0x3e   : > { %s230_s27 = scalar_lea.vmem [#allocation2], %s3340_s9  ;;  %s237_s29 = sadd.s32 %s3749_s16, %s3343_s10 }
  0x3f   : > { %s240_s2 = sshll.u32 %s230_s27, 4  ;;  %s3344_s18 = sshll.u32 %s237_s29, 6  ;;  %s5214_s2 = int_to_ptr.vmem [resolvable:$true] %s240_s2 }
  0x40   : > { %s5212_s11 = scalar_select %p45_p13, %s5013_s20, %s47_s13  }
  0x41   : > { %p5220_p0 = pnand %p4596_p12, %p5199_p10  ;;  %s5227_s14 = scalar_lea.hbm %s6067_s0, %s3344_s18 }
  0x42   : > { %s5229_s27 = scalar_lea.sflag [#allocation3], %s226_s15  ;;  %s4925_s29 = scalar_lea.hbm %s5227_s14, 4096 }
  0x43   : > { %p4926_p3 = scmp.ne.s32.totalorder %s5227_s14, %s4925_s29  ;;  %p4927_p5 = pneg %p5220_p0 }
  0x44   : > { %s4930_s12 = scalar_lea.hbm %s6067_s0, 16384  ;;  %p4931_p1 = scmp.lt.u32.totalorder %s5227_s14, %s6067_s0 }
  0x45   : > { %p4928_p7 = pnand %p4927_p5, %p4926_p3  ;;  %p4932_p2 = scmp.lt.u32.totalorder %s4930_s12, %s4925_s29 }
  0x46   : > { %p4934_p6 = scmp.lt.u32.totalorder %s4925_s29, %s5227_s14 }
  0x47   : > { %p4929_p9 = pneg %p4928_p7  ;;  %p4933_p4 = por %p4932_p2, %p4931_p1 }
  0x49   : > { %p4935_p8 = por %p4934_p6, %p4933_p4 }
  0x4b   : > { %p4936_p10 = pnand %p4935_p8, %p4929_p9 }
  0x4d   : > { %4939 = shalt.err (!%p4936_p10)
}
  0x4e   : > { %s4940_s15 = scalar_lea.vmem %s5214_s2, 4096  ;;  %s5038_s16 = smov [#allocation2]  }
  0x4f   : > { %p4941_p12 = scmp.ne.s32.totalorder %s5214_s2, %s4940_s15  ;;  %s4945_s17 = sshll.u32 %s5038_s16, 4  ;;  %s4946_s17 = int_to_ptr.vmem [resolvable:$false] %s4945_s17 }
  0x50   : > { %s4947_s6 = scalar_lea.vmem %s4946_s17, 8192  ;;  %p4948_p7 = scmp.lt.s32.totalorder %s5214_s2, %s4946_s17 }
  0x51   : > { %p4943_p13 = pnand %p4941_p12, %p4927_p5  ;;  %p4949_p1 = scmp.lt.s32.totalorder %s4947_s6, %s4940_s15 }
  0x53   : > { %p4944_p3 = pneg %p4943_p13  ;;  %p4950_p2 = por %p4949_p1, %p4948_p7 }
  0x55   : > { %p4951_p4 = pnand %p4950_p2, %p4944_p3 }
  0x57   : > { %4954 = shalt.err (!%p4951_p4)
}
  0x58   : > { %s5039_s9 = smov 128   ;;  %s5040_s10 = smov 8  }
  0x59   : > { %4584 = dma.hbm_to_vmem [thread:$0]  (!%p5220_p0), %s5227_s14, 4096, %s5214_s2, %s5229_s27, %s5039_s9, %s5039_s9, %s5040_s10  }
  0x5a   : > { %p6120_p5 = scmp.ne.s32.totalorder %s6111_s30, 0 }
  0x5c   : > { %252 = sbr.rel (%p6120_p5) target bundleno = 715 (0x2cb), region = 32 }
  0x63   : > { %s5260_s29 = sand.u32 1, %s5009_s19   ;;  %p6121_p9 = scmp.ne.s32.totalorder %s6108_s28, 0 }
  0x64   : > { %s5263_s13 = sshll.u32 %s5260_s29, 8  ;;  %s255_s23 = scalar_lea.sflag [#allocation3], %s5260_s29 }
  0x65   : > { %s5267_s12 = scalar_lea.vmem [#allocation2], %s5263_s13 }
  0x66   : > { %4988 = dma.done.wait (%p6121_p9), %s255_s23, 4096  }
  0x67   : > { %4990 = vsyncadd (%p6121_p9), %s255_s23, 4294963200  ;;  %p6122_p0 = scmp.eq.s32.totalorder %s5133_s26, 0 }
  0x69   : > { %4992 = dma.done.wait (%p6122_p0), [#allocation6], 12288   ;;  %p6123_p6 = pmov %p6122_p0 }
  0x6a   : > { %v319_v0 = vld [vmem:[%s5267_s12 + $0x80] sm:$0xff]  ;;  %v320_v2 = vld [vmem:[%s5267_s12 + $0x88] sm:$0xff]  ;;  %v306_v12 = vld [vmem:[%s5267_s12 + $0x18] sm:$0xff]  ;;  %s5864_s28 = scalar_lea.vmem [#allocation7], %s5263_s13  ;;  %s3024_s30 = sand.u32 1, %s5133_s26  }
  0x6b   : > { %4994 = vsyncadd (%p6123_p6), [#allocation6], 4294955008  ;;  %v303_v1 = vld [vmem:[%s5267_s12] sm:$0xff]  ;;  %v5280_v3 = vunpack.c.l.bf16 %v319_v0  ;;  %v5282_v4 = vunpack.c.h.bf16 %v319_v0  ;;  %v304_v7 = vld [vmem:[%s5267_s12 + $0x8] sm:$0xff]  ;;  %v5289_v8 = vunpack.c.l.bf16 %v320_v2  ;;  %v5291_v9 = vunpack.c.h.bf16 %v320_v2  ;;  %s5900_s14 = scalar_lea.vmem [#allocation10], %s5263_s13  ;;  %s5904_s27 = scalar_lea.vmem [#allocation8], %s5263_s13 }
  0x6c   : > { %v5284_v5 = vunpack.c.l.bf16 %v303_v1  ;;  %v5286_v6 = vunpack.c.h.bf16 %v303_v1  ;;  %v5293_v10 = vunpack.c.l.bf16 %v304_v7  ;;  %v5295_v11 = vunpack.c.h.bf16 %v304_v7  ;;  %v305_v17 = vld [vmem:[%s5267_s12 + $0x10] sm:$0xff]  ;;  %v322_v22 = vld [vmem:[%s5267_s12 + $0x98] sm:$0xff]  ;;  %v308_v32 = vld [vmem:[%s5267_s12 + $0x28] sm:$0xff]  ;;  %s3020_s18 = scalar_lea.sflag [#allocation4], %s5260_s29  ;;  %s5972_s7 = scalar_lea.sflag [#allocation9], %s3024_s30 }
  0x6d   : > { %v431_v13 = vmul.f32 %v5280_v3, %v5280_v3  ;;  %v432_v14 = vmul.f32 %v5282_v4, %v5282_v4  ;;  %v433_v18 = vmul.f32 %v5289_v8, %v5289_v8  ;;  %v434_v19 = vmul.f32 %v5291_v9, %v5291_v9  ;;  %v321_v27 = vld [vmem:[%s5267_s12 + $0x90] sm:$0xff]  ;;  %v307_v41 = vld [vmem:[%s5267_s12 + $0x20] sm:$0xff]  ;;  %v324_v48 = vld [vmem:[%s5267_s12 + $0xa8] sm:$0xff] }
  0x6e   : > { %v399_v15 = vmul.f32 %v5284_v5, %v5284_v5  ;;  %v400_v16 = vmul.f32 %v5286_v6, %v5286_v6  ;;  %v401_v20 = vmul.f32 %v5293_v10, %v5293_v10  ;;  %v402_v21 = vmul.f32 %v5295_v11, %v5295_v11  ;;  %v323_v49 = vld [vmem:[%s5267_s12 + $0xa0] sm:$0xff]  ;;  %v4692_v56 = vld [vmem:[#allocation5 + $0x34] ss:$24 sps:$4 sm:$0xff]   ;;  %v310_v0 = vld [vmem:[%s5267_s12 + $0x38] sm:$0xff] }
  0x6f   : > { %v511_v23 = vadd.f32 %v432_v14, %v431_v13  ;;  %v5316_v25 = vunpack.c.l.bf16 %v306_v12  ;;  %v5318_v26 = vunpack.c.h.bf16 %v306_v12  ;;  %v514_v28 = vadd.f32 %v434_v19, %v433_v18  ;;  %v4689_v54 = vld [vmem:[#allocation5 + $0x4] ss:$24 sps:$4 sm:$0xff]   ;;  %v4691_v55 = vld [vmem:[#allocation5] ss:$24 sps:$4 sm:$0xff]   ;;  %v4694_v1 = vld [vmem:[#allocation5 + $0x30] ss:$24 sps:$4 sm:$0xff]  }
  0x70   : > { %v463_v24 = vadd.f32 %v400_v16, %v399_v15  ;;  %v466_v29 = vadd.f32 %v402_v21, %v401_v20  ;;  %v5321_v30 = vunpack.c.l.bf16 %v305_v17  ;;  %v5323_v31 = vunpack.c.h.bf16 %v305_v17  ;;  %1413 = vmatprep.subr.bf16.mxu0 %v4689_v54  ;;  %4515 = vmatprep.subr.bf16.mxu1 %v4689_v54  ;;  %v309_v13 = vld [vmem:[%s5267_s12 + $0x30] sm:$0xff]  ;;  %v4695_v14 = vld [vmem:[#allocation5 + $0x64] ss:$24 sps:$4 sm:$0xff]  }
  0x71   : > { %512 = vadd.xlane.f32.xlu1 %v511_v23  ;;  %v405_v33 = vmul.f32 %v5316_v25, %v5316_v25  ;;  %v406_v34 = vmul.f32 %v5318_v26, %v5318_v26  ;;  %v5330_v35 = vunpack.c.l.bf16 %v322_v22  ;;  %v5332_v36 = vunpack.c.h.bf16 %v322_v22  ;;  %1414 = vmatpush1.bf16.msra.mxu0 %v4691_v55  ;;  %v326_v21 = vld [vmem:[%s5267_s12 + $0xb8] sm:$0xff] }
  0x72   : > { %464 = vadd.xlane.f32.xlu0 %v463_v24  ;;  %v403_v37 = vmul.f32 %v5321_v30, %v5321_v30  ;;  %v404_v38 = vmul.f32 %v5323_v31, %v5323_v31  ;;  %v5338_v39 = vunpack.c.l.bf16 %v321_v27  ;;  %v5340_v40 = vunpack.c.h.bf16 %v321_v27  ;;  %4531 = vmatpush1.bf16.msra.mxu1 %v4691_v55  ;;  %v4697_v22 = vld [vmem:[#allocation5 + $0x60] ss:$24 sps:$4 sm:$0xff]   ;;  %v4701_v54 = vld [vmem:[#allocation5 + $0xc4] ss:$24 sps:$4 sm:$0xff]  }
  0x73   : > { %v437_v42 = vmul.f32 %v5330_v35, %v5330_v35  ;;  %v438_v43 = vmul.f32 %v5332_v36, %v5332_v36  ;;  %v5347_v44 = vunpack.c.l.bf16 %v308_v32  ;;  %v472_v45 = vadd.f32 %v406_v34, %v405_v33  ;;  %1415 = vmatprep.subr.bf16.mxu0 %v4692_v56  ;;  %4516 = vmatprep.subr.bf16.mxu1 %v4692_v56 }
  0x74   : > { %v435_v46 = vmul.f32 %v5338_v39, %v5338_v39  ;;  %v436_v47 = vmul.f32 %v5340_v40, %v5340_v40  ;;  %v469_v50 = vadd.f32 %v404_v38, %v403_v37  ;;  %v5355_v51 = vunpack.c.h.bf16 %v308_v32  ;;  %v4698_v32 = vld [vmem:[#allocation5 + $0x94] ss:$24 sps:$4 sm:$0xff]  }
  0x75   : > { %515 = vadd.xlane.f32.xlu1 %v514_v28  ;;  %v5357_v52 = vunpack.c.l.bf16 %v307_v41  ;;  %v5359_v53 = vunpack.c.h.bf16 %v307_v41  ;;  %v520_v57 = vadd.f32 %v438_v43, %v437_v42  ;;  %v409_v58 = vmul.f32 %v5347_v44, %v5347_v44  ;;  %1416 = vmatpush1.bf16.msra.mxu0 %v4694_v1  ;;  %v312_v43 = vld [vmem:[%s5267_s12 + $0x48] sm:$0xff] }
  0x76   : > { %467 = vadd.xlane.f32.xlu0 %v466_v29  ;;  %v5363_v59 = vunpack.c.l.bf16 %v324_v48  ;;  %v517_v60 = vadd.f32 %v436_v47, %v435_v46  ;;  %v5365_v61 = vunpack.c.h.bf16 %v324_v48  ;;  %v5367_v62 = vunpack.c.l.bf16 %v323_v49  ;;  %4532 = vmatpush1.bf16.msra.mxu1 %v4694_v1  ;;  %v325_v29 = vld [vmem:[%s5267_s12 + $0xb0] sm:$0xff] }
  0x77   : > { %v5369_v63 = vunpack.c.h.bf16 %v323_v49  ;;  %v410_v2 = vmul.f32 %v5355_v51, %v5355_v51  ;;  %v407_v7 = vmul.f32 %v5357_v52, %v5357_v52  ;;  %v408_v12 = vmul.f32 %v5359_v53, %v5359_v53  ;;  %1417 = vmatprep.subr.bf16.mxu0 %v4695_v14  ;;  %4517 = vmatprep.subr.bf16.mxu1 %v4695_v14 }
  0x78   : > { %v441_v15 = vmul.f32 %v5363_v59, %v5363_v59  ;;  %v5381_v16 = vunpack.c.l.bf16 %v310_v0  ;;  %v5383_v17 = vunpack.c.h.bf16 %v310_v0  ;;  %v442_v18 = vmul.f32 %v5365_v61, %v5365_v61 }
  0x79   : > { %473 = vadd.xlane.f32.xlu1 %v472_v45  ;;  %v439_v19 = vmul.f32 %v5367_v62, %v5367_v62  ;;  %v440_v20 = vmul.f32 %v5369_v63, %v5369_v63  ;;  %v478_v23 = vadd.f32 %v410_v2, %v409_v58  ;;  %v475_v24 = vadd.f32 %v408_v12, %v407_v7  ;;  %v4700_v45 = vld [vmem:[#allocation5 + $0x90] ss:$24 sps:$4 sm:$0xff]   ;;  %v327_v7 = vld [vmem:[%s5267_s12 + $0xc0] sm:$0xff] }
  0x7a   : > { %470 = vadd.xlane.f32.xlu0 %v469_v50  ;;  %v5392_v27 = vunpack.c.l.bf16 %v309_v13  ;;  %v5394_v28 = vunpack.c.h.bf16 %v309_v13  ;;  %v413_v33 = vmul.f32 %v5381_v16, %v5381_v16  ;;  %v414_v34 = vmul.f32 %v5383_v17, %v5383_v17  ;;  %1418 = vmatpush1.bf16.msra.mxu0 %v4697_v22  ;;  %v311_v50 = vld [vmem:[%s5267_s12 + $0x40] sm:$0xff]  ;;  %v328_v58 = vld [vmem:[%s5267_s12 + $0xc8] sm:$0xff] }
  0x7b   : > { %v5401_v37 = vunpack.c.l.bf16 %v326_v21  ;;  %v526_v38 = vadd.f32 %v442_v18, %v441_v15  ;;  %v523_v41 = vadd.f32 %v440_v20, %v439_v19  ;;  %v5403_v42 = vunpack.c.h.bf16 %v326_v21  ;;  %4533 = vmatpush1.bf16.msra.mxu1 %v4697_v22  ;;  %1419 = vmatprep.subr.bf16.mxu0 %v4698_v32  ;;  %v4703_v12 = vld [vmem:[#allocation5 + $0xc0] ss:$24 sps:$4 sm:$0xff]   ;;  %v4704_v18 = vld [vmem:[#allocation5 + $0xf4] ss:$24 sps:$4 sm:$0xff]  }
  0x7c   : > { %v411_v46 = vmul.f32 %v5392_v27, %v5392_v27  ;;  %v412_v47 = vmul.f32 %v5394_v28, %v5394_v28  ;;  %v5410_v48 = vunpack.c.l.bf16 %v325_v29  ;;  %v5412_v49 = vunpack.c.h.bf16 %v325_v29  ;;  %4518 = vmatprep.subr.bf16.mxu1 %v4698_v32  ;;  %v314_v22 = vld [vmem:[%s5267_s12 + $0x58] sm:$0xff]  ;;  %v4706_v32 = vld [vmem:[#allocation5 + $0xf0] ss:$24 sps:$4 sm:$0xff]  }
  0x7d   : > { %521 = vadd.xlane.f32.xlu1 %v520_v57  ;;  %v484_v55 = vadd.f32 %v414_v34, %v413_v33  ;;  %v445_v56 = vmul.f32 %v5401_v37, %v5401_v37  ;;  %v5417_v57 = vunpack.c.l.bf16 %v312_v43  ;;  %v5422_v0 = vunpack.c.h.bf16 %v312_v43  ;;  %v313_v43 = vld [vmem:[%s5267_s12 + $0x50] sm:$0xff] }
  0x7e   : > { %518 = vadd.xlane.f32.xlu0 %v517_v60  ;;  %v446_v60 = vmul.f32 %v5403_v42, %v5403_v42  ;;  %v5424_v1 = vunpack.c.l.bf16 %v311_v50  ;;  %v5426_v2 = vunpack.c.h.bf16 %v311_v50  ;;  %1420 = vmatpush1.bf16.msra.mxu0 %v4700_v45  ;;  %v481_v13 = vadd.f32 %v412_v47, %v411_v46  ;;  %v4707_v46 = vld [vmem:[#allocation5 + $0x124] ss:$24 sps:$4 sm:$0xff]  }
  0x7f   : > { %6124 = vst [vmem:[#allocation26_spill] sm:$0xff] %v5417_v57  ;;  %4534 = vmatpush1.bf16.msra.mxu1 %v4700_v45  ;;  %v443_v14 = vmul.f32 %v5410_v48, %v5410_v48  ;;  %v444_v15 = vmul.f32 %v5412_v49, %v5412_v49  ;;  %1421 = vmatprep.subr.bf16.mxu0 %v4701_v54  ;;  %v5435_v20 = vunpack.c.l.bf16 %v328_v58  ;;  %v5437_v21 = vunpack.c.h.bf16 %v328_v58  ;;  %v330_v45 = vld [vmem:[%s5267_s12 + $0xd8] sm:$0xff] }
  0x80   : > { %4519 = vmatprep.subr.bf16.mxu1 %v4701_v54  ;;  %v417_v19 = vmul.f32 %v5417_v57, %v5417_v57  ;;  %v416_v29 = vmul.f32 %v5426_v2, %v5426_v2  ;;  %v532_v33 = vadd.f32 %v446_v60, %v445_v56  ;;  %v329_v54 = vld [vmem:[%s5267_s12 + $0xd0] sm:$0xff]  ;;  %v5457_v56 = vunpack.c.l.bf16 %v314_v22 }
  0x81   : > { %479 = vadd.xlane.f32.xlu1 %v478_v23  ;;  %6125 = vst [vmem:[#allocation27_spill] sm:$0xff] %v5435_v20  ;;  %v418_v23 = vmul.f32 %v5422_v0, %v5422_v0  ;;  %v529_v34 = vadd.f32 %v444_v15, %v443_v14  ;;  %v449_v47 = vmul.f32 %v5435_v20, %v5435_v20  ;;  %v5459_v60 = vunpack.c.h.bf16 %v314_v22  ;;  %v331_v20 = vld [vmem:[%s5267_s12 + $0xe0] sm:$0xff] }
  0x82   : > { %476 = vadd.xlane.f32.xlu0 %v475_v24  ;;  %v415_v24 = vmul.f32 %v5424_v1, %v5424_v1  ;;  %1422 = vmatpush1.bf16.msra.mxu0 %v4703_v12  ;;  %v450_v50 = vmul.f32 %v5437_v21, %v5437_v21  ;;  %6127 = vst [vmem:[#allocation29_spill] sm:$0xff] %v5457_v56  ;;  %v5465_v14 = vunpack.c.l.bf16 %v313_v43  ;;  %v5467_v15 = vunpack.c.h.bf16 %v313_v43  ;;  %v315_v43 = vld [vmem:[%s5267_s12 + $0x60] sm:$0xff] }
  0x83   : > { %4535 = vmatpush1.bf16.msra.mxu1 %v4703_v12  ;;  %1423 = vmatprep.subr.bf16.mxu0 %v4704_v18  ;;  %6128 = vst [vmem:[#allocation30_spill] sm:$0xff] %v5459_v60  ;;  %v5469_v22 = vunpack.c.l.bf16 %v330_v45 }
  0x84   : > { %4520 = vmatprep.subr.bf16.mxu1 %v4704_v18  ;;  %v487_v58 = vadd.f32 %v416_v29, %v415_v24  ;;  %6129 = vst [vmem:[#allocation31_spill] sm:$0xff] %v5465_v14  ;;  %6130 = vst [vmem:[#allocation32_spill] sm:$0xff] %v5467_v15  ;;  %v4710_v18 = vld [vmem:[#allocation5 + $0x154] ss:$24 sps:$4 sm:$0xff]   ;;  %v421_v29 = vmul.f32 %v5457_v56, %v5457_v56  ;;  %v4713_v56 = vld [vmem:[#allocation5 + $0x184] ss:$24 sps:$4 sm:$0xff]  }
  0x85   : > { %527 = vadd.xlane.f32.xlu1 %v526_v38  ;;  %v5446_v38 = vunpack.c.l.bf16 %v327_v7  ;;  %6131 = vst [vmem:[#allocation33_spill] sm:$0xff] %v5469_v22  ;;  %v316_v24 = vld [vmem:[%s5267_s12 + $0x68] sm:$0xff] }
  0x86   : > { %524 = vadd.xlane.f32.xlu0 %v523_v41  ;;  %v5448_v41 = vunpack.c.h.bf16 %v327_v7  ;;  %1424 = vmatpush1.bf16.msra.mxu0 %v4706_v32  ;;  %v4709_v7 = vld [vmem:[#allocation5 + $0x120] ss:$24 sps:$4 sm:$0xff]  }
  0x87   : > { %6126 = vst [vmem:[#allocation28_spill] sm:$0xff] %v5446_v38  ;;  %4536 = vmatpush1.bf16.msra.mxu1 %v4706_v32  ;;  %v447_v12 = vmul.f32 %v5446_v38, %v5446_v38  ;;  %1425 = vmatprep.subr.bf16.mxu0 %v4707_v46  ;;  %v422_v32 = vmul.f32 %v5459_v60, %v5459_v60  ;;  %v332_v60 = vld [vmem:[%s5267_s12 + $0xe8] sm:$0xff] }
  0x88   : > { %4521 = vmatprep.subr.bf16.mxu1 %v4707_v46  ;;  %v4712_v46 = vld [vmem:[#allocation5 + $0x150] ss:$24 sps:$4 sm:$0xff]  }
  0x89   : > { %485 = vadd.xlane.f32.xlu1 %v484_v55  ;;  %v490_v55 = vadd.f32 %v418_v23, %v417_v19  ;;  %v538_v19 = vadd.f32 %v450_v50, %v449_v47  ;;  %v5471_v23 = vunpack.c.h.bf16 %v330_v45  ;;  %v419_v47 = vmul.f32 %v5465_v14, %v5465_v14  ;;  %v4715_v14 = vld [vmem:[#allocation5 + $0x180] ss:$24 sps:$4 sm:$0xff]   ;;  %v4724_v38 = vld [vmem:[#allocation5 + $0x210] ss:$24 sps:$4 sm:$0xff]  }
  0x8a   : > { %482 = vadd.xlane.f32.xlu0 %v481_v13  ;;  %v448_v13 = vmul.f32 %v5448_v41, %v5448_v41  ;;  %1426 = vmatpush1.bf16.msra.mxu0 %v4709_v7  ;;  %v420_v50 = vmul.f32 %v5467_v15, %v5467_v15  ;;  %v5507_v15 = vunpack.c.h.bf16 %v332_v60 }
  0x8b   : > { %6132 = vst [vmem:[#allocation34_spill] sm:$0xff] %v5471_v23  ;;  %4537 = vmatpush1.bf16.msra.mxu1 %v4709_v7  ;;  %1427 = vmatprep.subr.bf16.mxu0 %v4710_v18  ;;  %v454_v7 = vmul.f32 %v5471_v23, %v5471_v23  ;;  %v5501_v23 = vunpack.c.l.bf16 %v315_v43 }
  0x8c   : > { %v535_v45 = vadd.f32 %v448_v13, %v447_v12  ;;  %4522 = vmatprep.subr.bf16.mxu1 %v4710_v18  ;;  %v5497_v13 = vunpack.c.l.bf16 %v316_v24  ;;  %v493_v18 = vadd.f32 %v420_v50, %v419_v47  ;;  %6140 = vst [vmem:[#allocation42_spill] sm:$0xff] %v5507_v15  ;;  %v318_v47 = vld [vmem:[%s5267_s12 + $0x78] sm:$0xff] }
  0x8d   : > { %533 = vadd.xlane.f32.xlu1 %v532_v33  ;;  %v5478_v33 = vunpack.c.l.bf16 %v329_v54  ;;  %6137 = vst [vmem:[#allocation39_spill] sm:$0xff] %v5501_v23 }
  0x8e   : > { %530 = vadd.xlane.f32.xlu0 %v529_v34  ;;  %v5480_v34 = vunpack.c.h.bf16 %v329_v54  ;;  %v453_v54 = vmul.f32 %v5469_v22, %v5469_v22  ;;  %6135 = vst [vmem:[#allocation37_spill] sm:$0xff] %v5497_v13  ;;  %1428 = vmatpush1.bf16.msra.mxu0 %v4712_v46  ;;  %v5499_v22 = vunpack.c.h.bf16 %v316_v24  ;;  %v5513_v24 = vunpack.c.h.bf16 %v331_v20 }
  0x8f   : > { %6133 = vst [vmem:[#allocation35_spill] sm:$0xff] %v5478_v33  ;;  %4538 = vmatpush1.bf16.msra.mxu1 %v4712_v46  ;;  %1429 = vmatprep.subr.bf16.mxu0 %v4713_v56 }
  0x90   : > { %6134 = vst [vmem:[#allocation36_spill] sm:$0xff] %v5480_v34  ;;  %v452_v12 = vmul.f32 %v5480_v34, %v5480_v34  ;;  %6136 = vst [vmem:[#allocation38_spill] sm:$0xff] %v5499_v22  ;;  %4523 = vmatprep.subr.bf16.mxu1 %v4713_v56  ;;  %v5505_v34 = vunpack.c.l.bf16 %v332_v60  ;;  %v426_v56 = vmul.f32 %v5499_v22, %v5499_v22 }
  0x91   : > { %491 = vadd.xlane.f32.xlu1 %v490_v55  ;;  %v496_v55 = vadd.f32 %v422_v32, %v421_v29  ;;  %v5503_v29 = vunpack.c.h.bf16 %v315_v43  ;;  %v4716_v32 = vld [vmem:[#allocation5 + $0x1b4] ss:$24 sps:$4 sm:$0xff]   ;;  %6142 = vst [vmem:[#allocation44_spill] sm:$0xff] %v5513_v24  ;;  %v4718_v43 = vld [vmem:[#allocation5 + $0x1b0] ss:$24 sps:$4 sm:$0xff]   ;;  %v423_v60 = vmul.f32 %v5501_v23, %v5501_v23 }
  0x92   : > { %488 = vadd.xlane.f32.xlu0 %v487_v58  ;;  %v451_v58 = vmul.f32 %v5478_v33, %v5478_v33  ;;  %v544_v33 = vadd.f32 %v454_v7, %v453_v54  ;;  %6139 = vst [vmem:[#allocation41_spill] sm:$0xff] %v5505_v34  ;;  %1430 = vmatpush1.bf16.msra.mxu0 %v4715_v14  ;;  %v317_v54 = vld [vmem:[%s5267_s12 + $0x70] sm:$0xff]  ;;  %v4719_v7 = vld [vmem:[#allocation5 + $0x1e4] ss:$24 sps:$4 sm:$0xff]  }
  0x93   : > { %6138 = vst [vmem:[#allocation40_spill] sm:$0xff] %v5503_v29  ;;  %4539 = vmatpush1.bf16.msra.mxu1 %v4715_v14  ;;  %v424_v50 = vmul.f32 %v5503_v29, %v5503_v29  ;;  %1431 = vmatprep.subr.bf16.mxu0 %v4716_v32  ;;  %v457_v14 = vmul.f32 %v5505_v34, %v5505_v34  ;;  %v5535_v34 = vunpack.c.l.bf16 %v317_v54  ;;  %v5537_v22 = vunpack.c.h.bf16 %v317_v54  ;;  %v333_v29 = vld [vmem:[%s5267_s12 + $0xf0] sm:$0xff]  ;;  %v4725_v54 = vld [vmem:[#allocation5 + $0x244] ss:$24 sps:$4 sm:$0xff]  }
  0x94   : > { %v541_v46 = vadd.f32 %v452_v12, %v451_v58  ;;  %4524 = vmatprep.subr.bf16.mxu1 %v4716_v32  ;;  %v5527_v58 = vunpack.c.l.bf16 %v318_v47 }
  0x95   : > { %539 = vadd.xlane.f32.xlu1 %v538_v19  ;;  %v425_v19 = vmul.f32 %v5497_v13, %v5497_v13  ;;  %v5533_v13 = vunpack.c.h.bf16 %v318_v47  ;;  %v499_v23 = vadd.f32 %v424_v50, %v423_v60  ;;  %v5553_v60 = vunpack.c.l.bf16 %v333_v29 }
  0x96   : > { %536 = vadd.xlane.f32.xlu0 %v535_v45  ;;  %v5511_v45 = vunpack.c.l.bf16 %v331_v20  ;;  %v4721_v20 = vld [vmem:[#allocation5 + $0x1e0] ss:$24 sps:$4 sm:$0xff]   ;;  %1432 = vmatpush1.bf16.msra.mxu0 %v4718_v43  ;;  %v429_v47 = vmul.f32 %v5527_v58, %v5527_v58  ;;  %v5555_v50 = vunpack.c.h.bf16 %v333_v29 }
  0x97   : > { %4540 = vmatpush1.bf16.msra.mxu1 %v4718_v43  ;;  %v502_v32 = vadd.f32 %v426_v56, %v425_v19  ;;  %1433 = vmatprep.subr.bf16.mxu0 %v4719_v7  ;;  %v427_v43 = vmul.f32 %v5535_v34, %v5535_v34  ;;  %v428_v56 = vmul.f32 %v5537_v22, %v5537_v22 }
  0x98   : > { %6141 = vst [vmem:[#allocation43_spill] sm:$0xff] %v5511_v45  ;;  %v455_v12 = vmul.f32 %v5511_v45, %v5511_v45  ;;  %4525 = vmatprep.subr.bf16.mxu1 %v4719_v7  ;;  %v4722_v45 = vld [vmem:[#allocation5 + $0x214] ss:$24 sps:$4 sm:$0xff]   ;;  %6144 = vst [vmem:[#allocation46_spill] sm:$0xff] %v5553_v60  ;;  %v459_v29 = vmul.f32 %v5553_v60, %v5553_v60 }
  0x99   : > { %497 = vadd.xlane.f32.xlu1 %v496_v55  ;;  %v458_v55 = vmul.f32 %v5507_v15, %v5507_v15  ;;  %v334_v15 = vld [vmem:[%s5267_s12 + $0xf8] sm:$0xff]  ;;  %6145 = vst [vmem:[#allocation47_spill] sm:$0xff] %v5555_v50 }
  0x9a   : > { %494 = vadd.xlane.f32.xlu0 %v493_v18  ;;  %v456_v18 = vmul.f32 %v5513_v24, %v5513_v24  ;;  %v5547_v19 = vunpack.c.h.bf16 %v334_v15  ;;  %1434 = vmatpush1.bf16.msra.mxu0 %v4721_v20 }
  0x9b   : > { %v550_v57 = vadd.f32 %v458_v55, %v457_v14  ;;  %4541 = vmatpush1.bf16.msra.mxu1 %v4721_v20  ;;  %1435 = vmatprep.subr.bf16.mxu0 %v4722_v45  ;;  %v4727_v20 = vld [vmem:[#allocation5 + $0x240] ss:$24 sps:$4 sm:$0xff]   ;;  %v505_v14 = vadd.f32 %v428_v56, %v427_v43  ;;  %v4728_v55 = vld [vmem:[#allocation5 + $0x274] ss:$24 sps:$4 sm:$0xff]   ;;  %v723_v56 = vlaneseq }
  0x9c   : > { %v547_v24 = vadd.f32 %v456_v18, %v455_v12  ;;  %4526 = vmatprep.subr.bf16.mxu1 %v4722_v45  ;;  %v460_v45 = vmul.f32 %v5555_v50, %v5555_v50  ;;  %v4730_v12 = vld [vmem:[#allocation5 + $0x270] ss:$24 sps:$4 sm:$0xff]   ;;  %v4742_v43 = vld [vmem:[#allocation5 + $0x14] ss:$24 sps:$4 sm:$0xff]  }
  0x9d   : > { %545 = vadd.xlane.f32.xlu1 %v544_v33  ;;  %v430_v33 = vmul.f32 %v5533_v13, %v5533_v13 }
  0x9e   : > { %542 = vadd.xlane.f32.xlu0 %v541_v46  ;;  %v5545_v46 = vunpack.c.l.bf16 %v334_v15  ;;  %1436 = vmatpush1.bf16.msra.mxu0 %v4724_v38 }
  0x9f   : > { %v508_v7 = vadd.f32 %v430_v33, %v429_v47  ;;  %4542 = vmatpush1.bf16.msra.mxu1 %v4724_v38  ;;  %1437 = vmatprep.subr.bf16.mxu0 %v4725_v54  ;;  %v553_v38 = vadd.f32 %v460_v45, %v459_v29  ;;  %v4736_v47 = vld [vmem:[#allocation5 + $0x2d0] ss:$24 sps:$4 sm:$0xff]   ;;  %v4739_v33 = vld [vmem:[#allocation5 + $0xc] ss:$24 sps:$4 sm:$0xff]   ;;  %v724_v29 = vshrl.u32 %v723_v56, 7 }
  0xa0   : > { %6143 = vst [vmem:[#allocation45_spill] sm:$0xff] %v5545_v46  ;;  %v461_v15 = vmul.f32 %v5545_v46, %v5545_v46  ;;  %4527 = vmatprep.subr.bf16.mxu1 %v4725_v54 }
  0xa1   : > { %503 = vadd.xlane.f32.xlu1 %v502_v32  ;;  %v4734_v32 = vld [vmem:[#allocation5 + $0x2d4] ss:$24 sps:$4 sm:$0xff]  }
  0xa2   : > { %500 = vadd.xlane.f32.xlu0 %v499_v23  ;;  %v462_v23 = vmul.f32 %v5547_v19, %v5547_v19  ;;  %1438 = vmatpush1.bf16.msra.mxu0 %v4727_v20 }
  0xa3   : > { %4543 = vmatpush1.bf16.msra.mxu1 %v4727_v20  ;;  %1439 = vmatprep.subr.bf16.mxu0 %v4728_v55 }
  0xa4   : > { %v556_v18 = vadd.f32 %v462_v23, %v461_v15  ;;  %4528 = vmatprep.subr.bf16.mxu1 %v4728_v55 }
  0xa5   : > { %551 = vadd.xlane.f32.xlu1 %v550_v57  ;;  %v4731_v57 = vld [vmem:[#allocation5 + $0x2a4] ss:$24 sps:$4 sm:$0xff]  }
  0xa6   : > { %548 = vadd.xlane.f32.xlu0 %v547_v24  ;;  %1440 = vmatpush1.bf16.msra.mxu0 %v4730_v12  ;;  %v4733_v24 = vld [vmem:[#allocation5 + $0x2a0] ss:$24 sps:$4 sm:$0xff]  }
  0xa7   : > { %4544 = vmatpush1.bf16.msra.mxu1 %v4730_v12  ;;  %1441 = vmatprep.subr.bf16.mxu0 %v4731_v57  ;;  %v720_v12 = vld [vmem:[%s6068_s1] sm:$0x3] }
  0xa8   : > { %4529 = vmatprep.subr.bf16.mxu1 %v4731_v57 }
  0xa9   : > { %509 = vadd.xlane.f32.xlu1 %v508_v7 }
  0xaa   : > { %506 = vadd.xlane.f32.xlu0 %v505_v14  ;;  %1442 = vmatpush1.bf16.msra.mxu0 %v4733_v24 }
  0xab   : > { %4545 = vmatpush1.bf16.msra.mxu1 %v4733_v24  ;;  %1443 = vmatprep.subr.bf16.mxu0 %v4734_v32 }
  0xac   : > { %4530 = vmatprep.subr.bf16.mxu1 %v4734_v32  ;;  %v721_v32 = vunpack.c.l.bf16 %v720_v12 }
  0xad   : > { %557 = vadd.xlane.f32.xlu1 %v556_v18 }
  0xae   : > { %554 = vadd.xlane.f32.xlu0 %v553_v38  ;;  %1444 = vmatpush1.bf16.msra.mxu0 %v4736_v47 }
  0xaf   : > { %4546 = vmatpush1.bf16.msra.mxu1 %v4736_v47  ;;  %1799 = vmatprep.subr.bf16.mxu0 %v4742_v43  ;;  %v729_v47 = vsub.s32 2, %v724_v29 }
  0xb0   : > { %1606 = vmatprep.subr.bf16.mxu1 %v4739_v33 }
  0xb1   : > { %v730_v60 = vrot.slane %v721_v32, %v729_v47 }
  0xfe   : > { %v513_v54 = vpop.xlane.xlu1 %512 }
  0xff   : > { %v465_v7 = vpop.xlane.xlu0 %464  ;;  %v576_v15 = vmul.f32 0.00390625, %v513_v54  ;;  %v725_v54 = vsub.s32 0, %v724_v29 }
 0x100   : > { %v560_v23 = vmul.f32 0.00390625, %v465_v7 }
 0x101   : > { %v608_v20 = vadd.f32 1e-05, %v576_v15 }
 0x102   : > { %v592_v14 = vadd.f32 1e-05, %v560_v23  ;;  %v516_v45 = vpop.xlane.xlu1 %515 }
 0x103   : > { %v468_v55 = vpop.xlane.xlu0 %467  ;;  %4833 = vrsqrt.f32 %v608_v20  ;;  %v577_v18 = vmul.f32 0.00390625, %v516_v45  ;;  %v726_v20 = vrot.slane %v721_v32, %v725_v54 }
 0x104   : > { %v561_v38 = vmul.f32 0.00390625, %v468_v55  ;;  %4835 = vrsqrt.f32 %v592_v14 }
 0x105   : > { %v609_v57 = vadd.f32 1e-05, %v577_v18 }
 0x106   : > { %v593_v24 = vadd.f32 1e-05, %v561_v38  ;;  %v474_v33 = vpop.xlane.xlu1 %473  ;;  %v5568_v38 = vrot.slane %v730_v60, %v725_v54 }
 0x107   : > { %v471_v43 = vpop.xlane.xlu0 %470  ;;  %4837 = vrsqrt.f32 %v609_v57  ;;  %v563_v7 = vmul.f32 0.00390625, %v474_v33 }
 0x108   : > { %v562_v56 = vmul.f32 0.00390625, %v471_v43  ;;  %4839 = vrsqrt.f32 %v593_v24  ;;  %v5571_v43 = vrot.slane %v726_v20, %v725_v54 }
 0x109   : > { %v595_v15 = vadd.f32 1e-05, %v563_v7 }
 0x10a   : > { %v594_v23 = vadd.f32 1e-05, %v562_v56  ;;  %v522_v50 = vpop.xlane.xlu1 %521 }
 0x10b   : > { %v519_v46 = vpop.xlane.xlu0 %518  ;;  %4841 = vrsqrt.f32 %v595_v15  ;;  %v579_v45 = vmul.f32 0.00390625, %v522_v50 }
 0x10c   : > { %v578_v14 = vmul.f32 0.00390625, %v519_v46  ;;  %4843 = vrsqrt.f32 %v594_v23 }
 0x10d   : > { %v4834_v55 = vpop.eup %4833  ;;  %v611_v12 = vadd.f32 1e-05, %v579_v45 }
 0x10e   : > { %v610_v18 = vadd.f32 1e-05, %v578_v14  ;;  %v4836_v29 = vpop.eup %4835  ;;  %v480_v57 = vpop.xlane.xlu1 %479  ;;  %v689_v24 = vmul.f32 %v4834_v55, %v5282_v4  ;;  %v688_v47 = vmul.f32 %v4834_v55, %v5280_v3 }
 0x10f   : > { %v477_v33 = vpop.xlane.xlu0 %476  ;;  %4845 = vrsqrt.f32 %v611_v12  ;;  %v565_v32 = vmul.f32 0.00390625, %v480_v57  ;;  %v657_v46 = vmul.f32 %v4836_v29, %v5286_v6  ;;  %v656_v23 = vmul.f32 %v4836_v29, %v5284_v5 }
 0x110   : > { %v564_v7 = vmul.f32 0.00390625, %v477_v33  ;;  %4847 = vrsqrt.f32 %v610_v18  ;;  %v774_v60 = vmul.f32 %v5568_v38, %v689_v24  ;;  %v773_v55 = vmul.f32 %v5571_v43, %v688_v47 }
 0x111   : > { %v4838_v50 = vpop.eup %4837  ;;  %v597_v56 = vadd.f32 1e-05, %v565_v32  ;;  %v742_v54 = vmul.f32 %v5568_v38, %v657_v46 }
 0x112   : > { %v596_v15 = vadd.f32 1e-05, %v564_v7  ;;  %v4840_v45 = vpop.eup %4839  ;;  %v528_v14 = vpop.xlane.xlu1 %527  ;;  %v691_v3 = vmul.f32 %v4838_v50, %v5291_v9  ;;  %v690_v20 = vmul.f32 %v4838_v50, %v5289_v8  ;;  %v741_v8 = vmul.f32 %v5571_v43, %v656_v23 }
 0x113   : > { %v525_v4 = vpop.xlane.xlu0 %524  ;;  %4849 = vrsqrt.f32 %v597_v56  ;;  %v581_v6 = vmul.f32 0.00390625, %v528_v14  ;;  %v659_v18 = vmul.f32 %v4840_v45, %v5295_v11  ;;  %v658_v5 = vmul.f32 %v4840_v45, %v5293_v10  ;;  %v4737_v11 = vld [vmem:[#allocation5 + $0x8] ss:$24 sps:$4 sm:$0xff]  }
 0x114   : > { %v580_v12 = vmul.f32 0.00390625, %v525_v4  ;;  %4851 = vrsqrt.f32 %v596_v15  ;;  %v776_v57 = vmul.f32 %v5568_v38, %v691_v3  ;;  %v775_v29 = vmul.f32 %v5571_v43, %v690_v20  ;;  %v4740_v3 = vld [vmem:[#allocation5 + $0x10] ss:$24 sps:$4 sm:$0xff]   ;;  %v4745_v20 = vld [vmem:[#allocation5 + $0x3c] ss:$24 sps:$4 sm:$0xff]  }
 0x115   : > { %v4842_v33 = vpop.eup %4841  ;;  %v613_v24 = vadd.f32 1e-05, %v581_v6  ;;  %v744_v9 = vmul.f32 %v5568_v38, %v659_v18  ;;  %v743_v56 = vmul.f32 %v5571_v43, %v658_v5 }
 0x116   : > { %v612_v32 = vadd.f32 1e-05, %v580_v12  ;;  %v4844_v47 = vpop.eup %4843  ;;  %v486_v7 = vpop.xlane.xlu1 %485  ;;  %v5587_v50 = vpack.c.bf16 %v776_v57, %v774_v60  ;;  %v5590_v15 = vpack.c.bf16 %v775_v29, %v773_v55  ;;  %v663_v10 = vmul.f32 %v4842_v33, %v5318_v26  ;;  %v4748_v55 = vld [vmem:[#allocation5 + $0x44] ss:$24 sps:$4 sm:$0xff]  }
 0x117   : > { %v483_v46 = vpop.xlane.xlu0 %482  ;;  %4853 = vrsqrt.f32 %v613_v24  ;;  %v567_v45 = vmul.f32 0.00390625, %v486_v7  ;;  %v5593_v4 = vpack.c.bf16 %v744_v9, %v742_v54  ;;  %v5596_v23 = vpack.c.bf16 %v743_v56, %v741_v8  ;;  %v4754_v56 = vld [vmem:[#allocation5 + $0x74] ss:$24 sps:$4 sm:$0xff]  }
 0x118   : > { %v566_v14 = vmul.f32 0.00390625, %v483_v46  ;;  %4855 = vrsqrt.f32 %v612_v32  ;;  %1525 = vmatprep.mubr.bf16.mxu1 %v5587_v50  ;;  %v661_v60 = vmul.f32 %v4844_v47, %v5323_v31  ;;  %v748_v6 = vmul.f32 %v5568_v38, %v663_v10  ;;  %v4743_v32 = vld [vmem:[#allocation5 + $0x38] ss:$24 sps:$4 sm:$0xff]  }
 0x119   : > { %v4846_v12 = vpop.eup %4845  ;;  %v599_v18 = vadd.f32 1e-05, %v567_v45  ;;  %1445 = vmatprep.mubr.bf16.mxu0 %v5593_v4  ;;  %1526 = vmatmul.mubr.bf16.vlgmr.msra.gmra.mrb[0].mxu1 %v5590_v15  ;;  %v660_v54 = vmul.f32 %v4844_v47, %v5321_v30  ;;  %v662_v57 = vmul.f32 %v4842_v33, %v5316_v25  ;;  %v4746_v30 = vld [vmem:[#allocation5 + $0x40] ss:$24 sps:$4 sm:$0xff]   ;;  %v4751_v33 = vld [vmem:[#allocation5 + $0x6c] ss:$24 sps:$4 sm:$0xff]  }
 0x11a   : > { %v598_v26 = vadd.f32 1e-05, %v566_v14  ;;  %v4848_v5 = vpop.eup %4847  ;;  %1446 = vmatmul.mubr.bf16.vlgmr.msra.gmra.mrb[0].mxu0 %v5596_v23  ;;  %1607 = vmatpush1.bf16.msra.mxu1 %v4737_v11  ;;  %v534_v29 = vpop.xlane.xlu1 %533  ;;  %v746_v24 = vmul.f32 %v5568_v38, %v661_v60  ;;  %v695_v9 = vmul.f32 %v4846_v12, %v5332_v36  ;;  %v694_v8 = vmul.f32 %v4846_v12, %v5330_v35 }
 0x11b   : > { %v531_v31 = vpop.xlane.xlu0 %530  ;;  %4857 = vrsqrt.f32 %v599_v18  ;;  %1800 = vmatpush1.bf16.msra.mxu0 %v4740_v3  ;;  %v583_v7 = vmul.f32 0.00390625, %v534_v29  ;;  %1608 = vmatprep.subr.bf16.mxu1 %v4745_v20  ;;  %v693_v25 = vmul.f32 %v4848_v5, %v5340_v40  ;;  %v745_v36 = vmul.f32 %v5571_v43, %v660_v54 }
 0x11c   : > { %v582_v46 = vmul.f32 0.00390625, %v531_v31  ;;  %4859 = vrsqrt.f32 %v598_v26  ;;  %v5609_v47 = vpack.c.bf16 %v748_v6, %v746_v24  ;;  %1801 = vmatprep.subr.bf16.mxu0 %v4748_v55  ;;  %v780_v11 = vmul.f32 %v5568_v38, %v695_v9  ;;  %v4749_v6 = vld [vmem:[#allocation5 + $0x68] ss:$24 sps:$4 sm:$0xff]   ;;  %v4757_v31 = vld [vmem:[#allocation5 + $0x9c] ss:$24 sps:$4 sm:$0xff]  }
 0x11d   : > { %v4850_v10 = vpop.eup %4849  ;;  %v615_v35 = vadd.f32 1e-05, %v583_v7  ;;  %v778_v14 = vmul.f32 %v5568_v38, %v693_v25  ;;  %v747_v3 = vmul.f32 %v5571_v43, %v662_v57  ;;  %v692_v55 = vmul.f32 %v4848_v5, %v5338_v39  ;;  %v4752_v57 = vld [vmem:[#allocation5 + $0x70] ss:$24 sps:$4 sm:$0xff]   ;;  %v4760_v5 = vld [vmem:[#allocation5 + $0xa4] ss:$24 sps:$4 sm:$0xff]  }
 0x11e   : > { %v614_v45 = vadd.f32 1e-05, %v582_v46  ;;  %v4852_v20 = vpop.eup %4851  ;;  %1455 = vmatprep.mubr.bf16.mxu0 %v5609_v47  ;;  %1609 = vmatpush1.bf16.msra.mxu1 %v4743_v32  ;;  %v492_v40 = vpop.xlane.xlu1 %491  ;;  %v779_v12 = vmul.f32 %v5571_v43, %v694_v8  ;;  %v667_v18 = vmul.f32 %v4850_v10, %v5355_v51 }
 0x11f   : > { %v489_v60 = vpop.xlane.xlu0 %488  ;;  %4861 = vrsqrt.f32 %v615_v35  ;;  %1802 = vmatpush1.bf16.msra.mxu0 %v4746_v30  ;;  %v569_v26 = vmul.f32 0.00390625, %v492_v40  ;;  %v5619_v29 = vpack.c.bf16 %v780_v11, %v778_v14  ;;  %1610 = vmatprep.subr.bf16.mxu1 %v4751_v33  ;;  %v5621_v24 = vpack.c.bf16 %v747_v3, %v745_v36  ;;  %v4758_v14 = vld [vmem:[#allocation5 + $0xa0] ss:$24 sps:$4 sm:$0xff]   ;;  %v4763_v3 = vld [vmem:[#allocation5 + $0xcc] ss:$24 sps:$4 sm:$0xff]  }
 0x120   : > { %v568_v54 = vmul.f32 0.00390625, %v489_v60  ;;  %4863 = vrsqrt.f32 %v614_v45  ;;  %1803 = vmatprep.subr.bf16.mxu0 %v4754_v56  ;;  %v777_v32 = vmul.f32 %v5571_v43, %v692_v55  ;;  %v665_v39 = vmul.f32 %v4852_v20, %v5359_v53  ;;  %v4755_v56 = vld [vmem:[#allocation5 + $0x98] ss:$24 sps:$4 sm:$0xff]   ;;  %v4766_v60 = vld [vmem:[#allocation5 + $0xd4] ss:$24 sps:$4 sm:$0xff]  }
 0x121   : > { %v4854_v9 = vpop.eup %4853  ;;  %v601_v51 = vadd.f32 1e-05, %v569_v26  ;;  %1535 = vmatprep.mubr.bf16.mxu1 %v5619_v29  ;;  %v752_v7 = vmul.f32 %v5568_v38, %v667_v18  ;;  %v664_v46 = vmul.f32 %v4852_v20, %v5357_v52 }
 0x122   : > { %v600_v8 = vadd.f32 1e-05, %v568_v54  ;;  %v4856_v30 = vpop.eup %4855  ;;  %1456 = vmatmul.mubr.bf16.gmra.mrb[4].mxu0 %v5621_v24  ;;  %v5629_v25 = vpack.c.bf16 %v779_v12, %v777_v32  ;;  %1611 = vmatpush1.bf16.msra.mxu1 %v4749_v6  ;;  %v540_v33 = vpop.xlane.xlu1 %539  ;;  %v750_v53 = vmul.f32 %v5568_v38, %v665_v39  ;;  %v699_v36 = vmul.f32 %v4854_v9, %v5365_v61 }
 0x123   : > { %v537_v11 = vpop.xlane.xlu0 %536  ;;  %4865 = vrsqrt.f32 %v601_v51  ;;  %1804 = vmatpush1.bf16.msra.mxu0 %v4752_v57  ;;  %v585_v35 = vmul.f32 0.00390625, %v540_v33  ;;  %1612 = vmatprep.subr.bf16.mxu1 %v4757_v31  ;;  %v697_v52 = vmul.f32 %v4856_v30, %v5369_v63  ;;  %v666_v61 = vmul.f32 %v4850_v10, %v5347_v44  ;;  %v4761_v31 = vld [vmem:[#allocation5 + $0xc8] ss:$24 sps:$4 sm:$0xff]  }
 0x124   : > { %v584_v45 = vmul.f32 0.00390625, %v537_v11  ;;  %4867 = vrsqrt.f32 %v600_v8  ;;  %1536 = vmatmul.mubr.bf16.gmra.mrb[4].mxu1 %v5629_v25  ;;  %v5635_v20 = vpack.c.bf16 %v752_v7, %v750_v53  ;;  %1805 = vmatprep.subr.bf16.mxu0 %v4760_v5  ;;  %v784_v40 = vmul.f32 %v5568_v38, %v699_v36  ;;  %v4764_v8 = vld [vmem:[#allocation5 + $0xd0] ss:$24 sps:$4 sm:$0xff]   ;;  %v4769_v7 = vld [vmem:[#allocation5 + $0xfc] ss:$24 sps:$4 sm:$0xff]  }
 0x125   : > { %v4858_v6 = vpop.eup %4857  ;;  %v617_v55 = vadd.f32 1e-05, %v585_v35  ;;  %v782_v18 = vmul.f32 %v5568_v38, %v697_v52  ;;  %v749_v26 = vmul.f32 %v5571_v43, %v664_v46  ;;  %v751_v32 = vmul.f32 %v5571_v43, %v666_v61  ;;  %v4767_v52 = vld [vmem:[#allocation5 + $0xf8] ss:$24 sps:$4 sm:$0xff]  }
 0x126   : > { %v616_v12 = vadd.f32 1e-05, %v584_v45  ;;  %v4860_v63 = vpop.eup %4859  ;;  %1465 = vmatprep.mubr.bf16.mxu0 %v5635_v20  ;;  %1613 = vmatpush1.bf16.msra.mxu1 %v4755_v56  ;;  %v498_v54 = vpop.xlane.xlu1 %497  ;;  %v696_v39 = vmul.f32 %v4856_v30, %v5367_v62  ;;  %v698_v44 = vmul.f32 %v4854_v9, %v5363_v59  ;;  %v4772_v62 = vld [vmem:[#allocation5 + $0x104] ss:$24 sps:$4 sm:$0xff]   ;;  %v671_v56 = vmul.f32 %v4858_v6, %v5383_v17  ;;  %v4770_v17 = vld [vmem:[#allocation5 + $0x100] ss:$24 sps:$4 sm:$0xff]  }
 0x127   : > { %v495_v57 = vpop.xlane.xlu0 %494  ;;  %4869 = vrsqrt.f32 %v617_v55  ;;  %1806 = vmatpush1.bf16.msra.mxu0 %v4758_v14  ;;  %v571_v10 = vmul.f32 0.00390625, %v498_v54  ;;  %v5645_v51 = vpack.c.bf16 %v784_v40, %v782_v18  ;;  %1614 = vmatprep.subr.bf16.mxu1 %v4763_v3  ;;  %v5647_v46 = vpack.c.bf16 %v751_v32, %v749_v26  ;;  %v4775_v55 = vld [vmem:[#allocation5 + $0x12c] ss:$24 sps:$4 sm:$0xff]  }
 0x128   : > { %v570_v5 = vmul.f32 0.00390625, %v495_v57  ;;  %4871 = vrsqrt.f32 %v616_v12  ;;  %1807 = vmatprep.subr.bf16.mxu0 %v4766_v60  ;;  %v781_v33 = vmul.f32 %v5571_v43, %v696_v39  ;;  %v783_v11 = vmul.f32 %v5571_v43, %v698_v44 }
 0x129   : > { %v4862_v30 = vpop.eup %4861  ;;  %v603_v59 = vadd.f32 1e-05, %v571_v10  ;;  %1545 = vmatprep.mubr.bf16.mxu1 %v5645_v51  ;;  %v669_v53 = vmul.f32 %v4860_v63, %v5394_v28  ;;  %v668_v40 = vmul.f32 %v4860_v63, %v5392_v27  ;;  %v756_v12 = vmul.f32 %v5568_v38, %v671_v56  ;;  %v4778_v27 = vld [vmem:[#allocation5 + $0x134] ss:$24 sps:$4 sm:$0xff]  }
 0x12a   : > { %v602_v9 = vadd.f32 1e-05, %v570_v5  ;;  %v4864_v36 = vpop.eup %4863  ;;  %1466 = vmatmul.mubr.bf16.gmra.mrb[8].mxu0 %v5647_v46  ;;  %v5655_v35 = vpack.c.bf16 %v783_v11, %v781_v33  ;;  %1615 = vmatpush1.bf16.msra.mxu1 %v4761_v31  ;;  %v546_v45 = vpop.xlane.xlu1 %545  ;;  %v703_v3 = vmul.f32 %v4862_v30, %v5403_v42  ;;  %v670_v57 = vmul.f32 %v4858_v6, %v5381_v16  ;;  %v4781_v6 = vld [vmem:[#allocation5 + $0x15c] ss:$24 sps:$4 sm:$0xff]  }
 0x12b   : > { %v543_v14 = vpop.xlane.xlu0 %542  ;;  %4873 = vrsqrt.f32 %v603_v59  ;;  %1808 = vmatpush1.bf16.msra.mxu0 %v4764_v8  ;;  %v587_v60 = vmul.f32 0.00390625, %v546_v45  ;;  %v754_v28 = vmul.f32 %v5568_v38, %v669_v53  ;;  %1616 = vmatprep.subr.bf16.mxu1 %v4769_v7  ;;  %v701_v18 = vmul.f32 %v4864_v36, %v5412_v49  ;;  %v4773_v49 = vld [vmem:[#allocation5 + $0x128] ss:$24 sps:$4 sm:$0xff]   ;;  %v4784_v45 = vld [vmem:[#allocation5 + $0x164] ss:$24 sps:$4 sm:$0xff]  }
 0x12c   : > { %v586_v61 = vmul.f32 0.00390625, %v543_v14  ;;  %4875 = vrsqrt.f32 %v602_v9  ;;  %1546 = vmatmul.mubr.bf16.gmra.mrb[8].mxu1 %v5655_v35  ;;  %1809 = vmatprep.subr.bf16.mxu0 %v4772_v62  ;;  %v788_v42 = vmul.f32 %v5568_v38, %v703_v3  ;;  %v753_v31 = vmul.f32 %v5571_v43, %v668_v40  ;;  %v4776_v59 = vld [vmem:[#allocation5 + $0x130] ss:$24 sps:$4 sm:$0xff]  }
 0x12d   : > { %v5664_v26 = vpop.eup %4865  ;;  %v619_v63 = vadd.f32 1e-05, %v587_v60  ;;  %v5668_v39 = vpack.c.bf16 %v756_v12, %v754_v28  ;;  %v786_v5 = vmul.f32 %v5568_v38, %v701_v18  ;;  %v700_v8 = vmul.f32 %v4864_v36, %v5410_v48  ;;  %v4787_v12 = vld [vmem:[#allocation5 + $0x18c] ss:$24 sps:$4 sm:$0xff]  }
 0x12e   : > { %v618_v54 = vadd.f32 1e-05, %v586_v61  ;;  %v4868_v32 = vpop.eup %4867  ;;  %1617 = vmatpush1.bf16.msra.mxu1 %v4767_v52  ;;  %v504_v44 = vpop.xlane.xlu1 %503  ;;  %v702_v7 = vmul.f32 %v4862_v30, %v5401_v37  ;;  %v755_v16 = vmul.f32 %v5571_v43, %v670_v57  ;;  %v675_v60 = vmul.f32 %v5664_v26, %v5422_v0  ;;  %v4779_v61 = vld [vmem:[#allocation5 + $0x158] ss:$24 sps:$4 sm:$0xff]   ;;  %v4790_v57 = vld [vmem:[#allocation5 + $0x194] ss:$24 sps:$4 sm:$0xff]  }
 0x12f   : > { %v501_v10 = vpop.xlane.xlu0 %500  ;;  %4877 = vrsqrt.f32 %v619_v63  ;;  %1810 = vmatpush1.bf16.msra.mxu0 %v4770_v17  ;;  %v573_v33 = vmul.f32 0.00390625, %v504_v44  ;;  %1618 = vmatprep.subr.bf16.mxu1 %v4775_v55  ;;  %v5675_v62 = vpack.c.bf16 %v788_v42, %v786_v5  ;;  %v785_v9 = vmul.f32 %v5571_v43, %v700_v8  ;;  %v4782_v42 = vld [vmem:[#allocation5 + $0x160] ss:$24 sps:$4 sm:$0xff]  }
 0x130   : > { %v572_v11 = vmul.f32 0.00390625, %v501_v10  ;;  %4879 = vrsqrt.f32 %v618_v54  ;;  %1475 = vmatprep.mubr.bf16.mxu0 %v5668_v39  ;;  %1811 = vmatprep.subr.bf16.mxu0 %v4778_v27  ;;  %v787_v48 = vmul.f32 %v5571_v43, %v702_v7  ;;  %v5679_v56 = vpack.c.bf16 %v755_v16, %v753_v31  ;;  %v6146_v44 = vld [vmem:[#allocation26_spill] sm:$0xff] }
 0x131   : > { %v4870_v37 = vpop.eup %4869  ;;  %v605_v30 = vadd.f32 1e-05, %v573_v33  ;;  %v673_v36 = vmul.f32 %v4868_v32, %v5426_v2  ;;  %1555 = vmatprep.mubr.bf16.mxu1 %v5675_v62  ;;  %v760_v18 = vmul.f32 %v5568_v38, %v675_v60  ;;  %v672_v31 = vmul.f32 %v4868_v32, %v5424_v1  ;;  %v4785_v33 = vld [vmem:[#allocation5 + $0x188] ss:$24 sps:$4 sm:$0xff]  }
 0x132   : > { %v604_v53 = vadd.f32 1e-05, %v572_v11  ;;  %v4872_v14 = vpop.eup %4871  ;;  %v5683_v52 = vpack.c.bf16 %v787_v48, %v785_v9  ;;  %1619 = vmatpush1.bf16.msra.mxu1 %v4773_v49  ;;  %v552_v3 = vpop.xlane.xlu1 %551  ;;  %v707_v28 = vmul.f32 %v4870_v37, %v5437_v21  ;;  %1476 = vmatmul.mubr.bf16.gmra.mrb[12].mxu0 %v5679_v56  ;;  %v674_v10 = vmul.f32 %v5664_v26, %v6146_v44  ;;  %v6147_v11 = vld [vmem:[#allocation28_spill] sm:$0xff] }
 0x133   : > { %v549_v40 = vpop.xlane.xlu0 %548  ;;  %4881 = vrsqrt.f32 %v605_v30  ;;  %v589_v17 = vmul.f32 0.00390625, %v552_v3  ;;  %v758_v55 = vmul.f32 %v5568_v38, %v673_v36  ;;  %1620 = vmatprep.subr.bf16.mxu1 %v4781_v6  ;;  %1812 = vmatpush1.bf16.msra.mxu0 %v4776_v59  ;;  %v705_v0 = vmul.f32 %v4872_v14, %v5448_v41  ;;  %v6148_v6 = vld [vmem:[#allocation27_spill] sm:$0xff]  ;;  %v4793_v26 = vld [vmem:[#allocation5 + $0x1bc] ss:$24 sps:$4 sm:$0xff]  }
 0x134   : > { %v588_v2 = vmul.f32 0.00390625, %v549_v40  ;;  %4883 = vrsqrt.f32 %v604_v53  ;;  %1556 = vmatmul.mubr.bf16.gmra.mrb[12].mxu1 %v5683_v52  ;;  %v792_v21 = vmul.f32 %v5568_v38, %v707_v28  ;;  %1813 = vmatprep.subr.bf16.mxu0 %v4784_v45  ;;  %v704_v16 = vmul.f32 %v4872_v14, %v6147_v11  ;;  %v4788_v14 = vld [vmem:[#allocation5 + $0x190] ss:$24 sps:$4 sm:$0xff]  }
 0x135   : > { %v5694_v27 = vpop.eup %4873  ;;  %v621_v63 = vadd.f32 1e-05, %v589_v17  ;;  %v5699_v49 = vpack.c.bf16 %v760_v18, %v758_v55  ;;  %v790_v41 = vmul.f32 %v5568_v38, %v705_v0  ;;  %v706_v59 = vmul.f32 %v4870_v37, %v6148_v6  ;;  %v6149_v40 = vld [vmem:[#allocation32_spill] sm:$0xff]  ;;  %v6150_v55 = vld [vmem:[#allocation30_spill] sm:$0xff] }
 0x136   : > { %v620_v54 = vadd.f32 1e-05, %v588_v2  ;;  %v4876_v5 = vpop.eup %4875  ;;  %1621 = vmatpush1.bf16.msra.mxu1 %v4779_v61  ;;  %v510_v8 = vpop.xlane.xlu1 %509  ;;  %v757_v1 = vmul.f32 %v5571_v43, %v672_v31  ;;  %v759_v30 = vmul.f32 %v5571_v43, %v674_v10  ;;  %v789_v53 = vmul.f32 %v5571_v43, %v704_v16  ;;  %v4791_v18 = vld [vmem:[#allocation5 + $0x1b8] ss:$24 sps:$4 sm:$0xff]   ;;  %v6151_v0 = vld [vmem:[#allocation34_spill] sm:$0xff] }
 0x137   : > { %v507_v7 = vpop.xlane.xlu0 %506  ;;  %4885 = vrsqrt.f32 %v621_v63  ;;  %v575_v9 = vmul.f32 0.00390625, %v510_v8  ;;  %1622 = vmatprep.subr.bf16.mxu1 %v4787_v12  ;;  %1485 = vmatprep.mubr.bf16.mxu0 %v5699_v49  ;;  %v5706_v32 = vpack.c.bf16 %v792_v21, %v790_v41  ;;  %v791_v3 = vmul.f32 %v5571_v43, %v706_v59  ;;  %v4799_v31 = vld [vmem:[#allocation5 + $0x1ec] ss:$24 sps:$4 sm:$0xff]   ;;  %v6152_v8 = vld [vmem:[#allocation36_spill] sm:$0xff]  ;;  %v4794_v16 = vld [vmem:[#allocation5 + $0x1c0] ss:$24 sps:$4 sm:$0xff]  }
 0x138   : > { %v574_v48 = vmul.f32 0.00390625, %v507_v7  ;;  %4887 = vrsqrt.f32 %v620_v54  ;;  %1814 = vmatpush1.bf16.msra.mxu0 %v4782_v42  ;;  %v677_v60 = vmul.f32 %v4876_v5, %v6149_v40  ;;  %v5713_v28 = vpack.c.bf16 %v759_v30, %v757_v1  ;;  %v4796_v42 = vld [vmem:[#allocation5 + $0x1c4] ss:$24 sps:$4 sm:$0xff]   ;;  %v6153_v59 = vld [vmem:[#allocation31_spill] sm:$0xff] }
 0x139   : > { %v4878_v36 = vpop.eup %4877  ;;  %v607_v45 = vadd.f32 1e-05, %v575_v9  ;;  %1815 = vmatprep.subr.bf16.mxu0 %v4790_v57  ;;  %1565 = vmatprep.mubr.bf16.mxu1 %v5706_v32  ;;  %v679_v12 = vmul.f32 %v5694_v27, %v6150_v55  ;;  %v5718_v63 = vpack.c.bf16 %v791_v3, %v789_v53  ;;  %v676_v9 = vmul.f32 %v4876_v5, %v6153_v59  ;;  %v4802_v30 = vld [vmem:[#allocation5 + $0x1f4] ss:$24 sps:$4 sm:$0xff]   ;;  %v6154_v53 = vld [vmem:[#allocation29_spill] sm:$0xff] }
 0x13a   : > { %v606_v37 = vadd.f32 1e-05, %v574_v48  ;;  %v4880_v61 = vpop.eup %4879  ;;  %1623 = vmatpush1.bf16.msra.mxu1 %v4785_v33  ;;  %v558_v17 = vpop.xlane.xlu1 %557  ;;  %v711_v21 = vmul.f32 %v4878_v36, %v6151_v0  ;;  %1486 = vmatmul.mubr.bf16.gmra.mrb[16].mxu0 %v5713_v28  ;;  %v762_v44 = vmul.f32 %v5568_v38, %v677_v60  ;;  %v6155_v3 = vld [vmem:[#allocation35_spill] sm:$0xff]  ;;  %v6156_v60 = vld [vmem:[#allocation33_spill] sm:$0xff]  ;;  %v6157_v55 = vld [vmem:[#allocation40_spill] sm:$0xff] }
 0x13b   : > { %v555_v2 = vpop.xlane.xlu0 %554  ;;  %4889 = vrsqrt.f32 %v607_v45  ;;  %v591_v54 = vmul.f32 0.00390625, %v558_v17  ;;  %1624 = vmatprep.subr.bf16.mxu1 %v4793_v26  ;;  %v764_v10 = vmul.f32 %v5568_v38, %v679_v12  ;;  %v709_v7 = vmul.f32 %v4880_v61, %v6152_v8  ;;  %v4808_v8 = vld [vmem:[#allocation5 + $0x224] ss:$24 sps:$4 sm:$0xff]   ;;  %v6161_v59 = vld [vmem:[#allocation44_spill] sm:$0xff] }
 0x13c   : > { %v590_v57 = vmul.f32 0.00390625, %v555_v2  ;;  %4891 = vrsqrt.f32 %v606_v37  ;;  %1566 = vmatmul.mubr.bf16.gmra.mrb[16].mxu1 %v5718_v63  ;;  %1816 = vmatpush1.bf16.msra.mxu0 %v4788_v14  ;;  %v796_v6 = vmul.f32 %v5568_v38, %v711_v21  ;;  %v678_v45 = vmul.f32 %v5694_v27, %v6154_v53  ;;  %v4797_v37 = vld [vmem:[#allocation5 + $0x1e8] ss:$24 sps:$4 sm:$0xff]   ;;  %v4811_v53 = vld [vmem:[#allocation5 + $0x24c] ss:$24 sps:$4 sm:$0xff]  }
 0x13d   : > { %v4882_v41 = vpop.eup %4881  ;;  %v623_v33 = vadd.f32 1e-05, %v591_v54  ;;  %v5727_v1 = vpack.c.bf16 %v764_v10, %v762_v44  ;;  %1817 = vmatprep.subr.bf16.mxu0 %v4796_v42  ;;  %v794_v26 = vmul.f32 %v5568_v38, %v709_v7  ;;  %v761_v14 = vmul.f32 %v5571_v43, %v676_v9  ;;  %v4800_v42 = vld [vmem:[#allocation5 + $0x1f0] ss:$24 sps:$4 sm:$0xff]   ;;  %v6160_v7 = vld [vmem:[#allocation42_spill] sm:$0xff] }
 0x13e   : > { %v622_v11 = vadd.f32 1e-05, %v590_v57  ;;  %v4884_v48 = vpop.eup %4883  ;;  %1625 = vmatpush1.bf16.msra.mxu1 %v4791_v18  ;;  %v708_v40 = vmul.f32 %v4880_v61, %v6155_v3  ;;  %v710_v5 = vmul.f32 %v4878_v36, %v6156_v60  ;;  %v763_v2 = vmul.f32 %v5571_v43, %v678_v45  ;;  %v4805_v18 = vld [vmem:[#allocation5 + $0x21c] ss:$24 sps:$4 sm:$0xff]   ;;  %v6158_v61 = vld [vmem:[#allocation38_spill] sm:$0xff]  ;;  %v6159_v36 = vld [vmem:[#allocation39_spill] sm:$0xff] }
 0x13f   : > { %4893 = vrsqrt.f32 %v623_v33  ;;  %1626 = vmatprep.subr.bf16.mxu1 %v4799_v31  ;;  %1495 = vmatprep.mubr.bf16.mxu0 %v5727_v1  ;;  %v5736_v17 = vpack.c.bf16 %v796_v6, %v794_v26  ;;  %v681_v12 = vmul.f32 %v4884_v48, %v6157_v55  ;;  %v683_v54 = vmul.f32 %v4882_v41, %v6158_v61  ;;  %v4803_v6 = vld [vmem:[#allocation5 + $0x218] ss:$24 sps:$4 sm:$0xff]   ;;  %v4814_v55 = vld [vmem:[#allocation5 + $0x254] ss:$24 sps:$4 sm:$0xff]   ;;  %v4809_v61 = vld [vmem:[#allocation5 + $0x248] ss:$24 sps:$4 sm:$0xff]  }
 0x140   : > { %4895 = vrsqrt.f32 %v622_v11  ;;  %1818 = vmatpush1.bf16.msra.mxu0 %v4794_v16  ;;  %v793_v0 = vmul.f32 %v5571_v43, %v708_v40  ;;  %v795_v21 = vmul.f32 %v5571_v43, %v710_v5  ;;  %v680_v57 = vmul.f32 %v4884_v48, %v6159_v36  ;;  %v6162_v48 = vld [vmem:[#allocation37_spill] sm:$0xff] }
 0x141   : > { %v4886_v27 = vpop.eup %4885  ;;  %1575 = vmatprep.mubr.bf16.mxu1 %v5736_v17  ;;  %1819 = vmatprep.subr.bf16.mxu0 %v4802_v30  ;;  %v5745_v44 = vpack.c.bf16 %v763_v2, %v761_v14  ;;  %v766_v10 = vmul.f32 %v5568_v38, %v681_v12  ;;  %v768_v16 = vmul.f32 %v5568_v38, %v683_v54  ;;  %v6163_v14 = vld [vmem:[#allocation43_spill] sm:$0xff]  ;;  %v4806_v60 = vld [vmem:[#allocation5 + $0x220] ss:$24 sps:$4 sm:$0xff]  }
 0x142   : > { %v4888_v31 = vpop.eup %4887  ;;  %v715_v33 = vmul.f32 %v4886_v27, %v6160_v7  ;;  %v5749_v11 = vpack.c.bf16 %v795_v21, %v793_v0  ;;  %1627 = vmatpush1.bf16.msra.mxu1 %v4797_v37  ;;  %v682_v26 = vmul.f32 %v4882_v41, %v6162_v48  ;;  %v765_v45 = vmul.f32 %v5571_v43, %v680_v57  ;;  %v6164_v12 = vld [vmem:[#allocation41_spill] sm:$0xff] }
 0x143   : > { %v713_v9 = vmul.f32 %v4888_v31, %v6161_v59  ;;  %1496 = vmatmul.mubr.bf16.gmra.mrb[20].mxu0 %v5745_v44  ;;  %1628 = vmatprep.subr.bf16.mxu1 %v4805_v18  ;;  %v712_v3 = vmul.f32 %v4888_v31, %v6163_v14  ;;  %v5759_v37 = vpack.c.bf16 %v768_v16, %v766_v10  ;;  %v4817_v31 = vld [vmem:[#allocation5 + $0x27c] ss:$24 sps:$4 sm:$0xff]   ;;  %v6167_v14 = vld [vmem:[#allocation46_spill] sm:$0xff] }
 0x144   : > { %v800_v30 = vmul.f32 %v5568_v38, %v715_v33  ;;  %1576 = vmatmul.mubr.bf16.gmra.mrb[20].mxu1 %v5749_v11  ;;  %1820 = vmatpush1.bf16.msra.mxu0 %v4800_v42  ;;  %v767_v41 = vmul.f32 %v5571_v43, %v682_v26  ;;  %v714_v18 = vmul.f32 %v4886_v27, %v6164_v12  ;;  %v4812_v27 = vld [vmem:[#allocation5 + $0x250] ss:$24 sps:$4 sm:$0xff]   ;;  %v4820_v16 = vld [vmem:[#allocation5 + $0x284] ss:$24 sps:$4 sm:$0xff]  }
 0x145   : > { %v4890_v40 = vpop.eup %4889  ;;  %v798_v5 = vmul.f32 %v5568_v38, %v713_v9  ;;  %1821 = vmatprep.subr.bf16.mxu0 %v4808_v8  ;;  %v797_v0 = vmul.f32 %v5571_v43, %v712_v3  ;;  %1505 = vmatprep.mubr.bf16.mxu0 %v5759_v37  ;;  %v6165_v9 = vld [vmem:[#allocation45_spill] sm:$0xff] }
 0x146   : > { %v4892_v2 = vpop.eup %4891  ;;  %v687_v21 = vmul.f32 %v4890_v40, %v5533_v13  ;;  %1629 = vmatpush1.bf16.msra.mxu1 %v4803_v6  ;;  %v799_v36 = vmul.f32 %v5571_v43, %v714_v18  ;;  %v5773_v13 = vpack.c.bf16 %v767_v41, %v765_v45  ;;  %v686_v7 = vmul.f32 %v4890_v40, %v5527_v58  ;;  %v4823_v40 = vld [vmem:[#allocation5 + $0x2ac] ss:$24 sps:$4 sm:$0xff]   ;;  %v4821_v18 = vld [vmem:[#allocation5 + $0x2a8] ss:$24 sps:$4 sm:$0xff]  }
 0x147   : > { %v5767_v42 = vpack.c.bf16 %v800_v30, %v798_v5  ;;  %v685_v54 = vmul.f32 %v4892_v2, %v5537_v22  ;;  %1630 = vmatprep.subr.bf16.mxu1 %v4811_v53  ;;  %v684_v59 = vmul.f32 %v4892_v2, %v5535_v34  ;;  %v4815_v30 = vld [vmem:[#allocation5 + $0x278] ss:$24 sps:$4 sm:$0xff]   ;;  %v6166_v53 = vld [vmem:[#allocation47_spill] sm:$0xff] }
 0x148   : > { %v772_v57 = vmul.f32 %v5568_v38, %v687_v21  ;;  %1822 = vmatpush1.bf16.msra.mxu0 %v4806_v60  ;;  %v5777_v22 = vpack.c.bf16 %v799_v36, %v797_v0  ;;  %v4818_v34 = vld [vmem:[#allocation5 + $0x280] ss:$24 sps:$4 sm:$0xff]   ;;  %v4826_v41 = vld [vmem:[#allocation5 + $0x2b4] ss:$24 sps:$4 sm:$0xff]   ;;  %v4832_v36 = vld [vmem:[#allocation5 + $0x2e4] ss:$24 sps:$4 sm:$0xff]  }
 0x149   : > { %v4894_v10 = vpop.eup %4893  ;;  %1585 = vmatprep.mubr.bf16.mxu1 %v5767_v42  ;;  %v770_v8 = vmul.f32 %v5568_v38, %v685_v54  ;;  %1823 = vmatprep.subr.bf16.mxu0 %v4814_v55  ;;  %v769_v2 = vmul.f32 %v5571_v43, %v684_v59  ;;  %v771_v55 = vmul.f32 %v5571_v43, %v686_v7  ;;  %v4829_v0 = vld [vmem:[#allocation5 + $0x2dc] ss:$24 sps:$4 sm:$0xff]   ;;  %v4827_v54 = vld [vmem:[#allocation5 + $0x2d8] ss:$24 sps:$4 sm:$0xff]  }
 0x14a   : > { %v4896_v33 = vpop.eup %4895  ;;  %v719_v6 = vmul.f32 %v4894_v10, %v5547_v19  ;;  %v718_v48 = vmul.f32 %v4894_v10, %v6165_v9  ;;  %1631 = vmatpush1.bf16.msra.mxu1 %v4809_v61 }
 0x14b   : > { %v5782_v26 = vpack.c.bf16 %v772_v57, %v770_v8  ;;  %v717_v45 = vmul.f32 %v4896_v33, %v6166_v53  ;;  %v716_v3 = vmul.f32 %v4896_v33, %v6167_v14  ;;  %1506 = vmatmul.mubr.bf16.gmra.mrb[24].mxu0 %v5773_v13  ;;  %1632 = vmatprep.subr.bf16.mxu1 %v4817_v31 }
 0x14c   : > { %v804_v58 = vmul.f32 %v5568_v38, %v719_v6  ;;  %1586 = vmatmul.mubr.bf16.gmra.mrb[24].mxu1 %v5777_v22  ;;  %1824 = vmatpush1.bf16.msra.mxu0 %v4812_v27  ;;  %v803_v5 = vmul.f32 %v5571_v43, %v718_v48  ;;  %v819_v61 = vpack.c.bf16 %v771_v55, %v769_v2 }
 0x14d   : > { %v802_v19 = vmul.f32 %v5568_v38, %v717_v45  ;;  %v801_v60 = vmul.f32 %v5571_v43, %v716_v3  ;;  %1515 = vmatprep.mubr.bf16.mxu0 %v5782_v26  ;;  %1825 = vmatprep.subr.bf16.mxu0 %v4820_v16  ;;  %v4824_v38 = vld [vmem:[#allocation5 + $0x2b0] ss:$24 sps:$4 sm:$0xff]   ;;  %v4830_v43 = vld [vmem:[#allocation5 + $0x2e0] ss:$24 sps:$4 sm:$0xff]  }
 0x14e   : > { %1633 = vmatpush1.bf16.msra.mxu1 %v4815_v30 }
 0x14f   : > { %v5795_v12 = vpack.c.bf16 %v804_v58, %v802_v19  ;;  %1634 = vmatprep.subr.bf16.mxu1 %v4823_v40  ;;  %v5798_v21 = vpack.c.bf16 %v803_v5, %v801_v60 }
 0x150   : > { %1826 = vmatpush1.bf16.msra.mxu0 %v4818_v34 }
 0x151   : > { %1595 = vmatprep.mubr.bf16.mxu1 %v5795_v12  ;;  %1827 = vmatprep.subr.bf16.mxu0 %v4826_v41 }
 0x152   : > { %1635 = vmatpush1.bf16.msra.mxu1 %v4821_v18 }
 0x153   : > { %1516 = vmatmul.mubr.bf16.gmra.mrb[28].mxu0 %v819_v61  ;;  %1636 = vmatprep.subr.bf16.mxu1 %v4829_v0 }
 0x154   : > { %1596 = vmatmul.mubr.bf16.gmra.mrb[28].mxu1 %v5798_v21  ;;  %1828 = vmatpush1.bf16.msra.mxu0 %v4824_v38 }
 0x155   : > { %1638 = vmatprep.mubr.bf16.mxu1 %v5593_v4  ;;  %1831 = vmatprep.mubr.bf16.mxu0 %v5593_v4 }
 0x156   : > { %1829 = vmatprep.subr.bf16.mxu0 %v4832_v36  ;;  %1637 = vmatpush1.bf16.msra.mxu1 %v4827_v54 }
 0x158   : > { %1830 = vmatpush1.bf16.msra.mxu0 %v4830_v43 }
 0x15b   : > { %1832 = vmatmul.mubr.bf16.vlgmr.msra.gmra.mrb[32].mxu0 %v5596_v23 }
 0x15c   : > { %1639 = vmatmul.mubr.bf16.vlgmr.msra.gmra.mrb[32].mxu1 %v5596_v23  ;;  %1841 = vmatprep.mubr.bf16.mxu0 %v5609_v47 }
 0x15d   : > { %1648 = vmatprep.mubr.bf16.mxu1 %v5609_v47 }
 0x163   : > { %1842 = vmatmul.mubr.bf16.gmra.mrb[36].mxu0 %v5621_v24 }
 0x164   : > { %1649 = vmatmul.mubr.bf16.gmra.mrb[36].mxu1 %v5621_v24  ;;  %1851 = vmatprep.mubr.bf16.mxu0 %v5635_v20 }
 0x165   : > { %1658 = vmatprep.mubr.bf16.mxu1 %v5635_v20 }
 0x16b   : > { %1852 = vmatmul.mubr.bf16.gmra.mrb[40].mxu0 %v5647_v46 }
 0x16c   : > { %1659 = vmatmul.mubr.bf16.gmra.mrb[40].mxu1 %v5647_v46  ;;  %1861 = vmatprep.mubr.bf16.mxu0 %v5668_v39 }
 0x16d   : > { %1668 = vmatprep.mubr.bf16.mxu1 %v5668_v39 }
 0x173   : > { %1862 = vmatmul.mubr.bf16.gmra.mrb[44].mxu0 %v5679_v56 }
 0x174   : > { %1669 = vmatmul.mubr.bf16.gmra.mrb[44].mxu1 %v5679_v56  ;;  %1871 = vmatprep.mubr.bf16.mxu0 %v5699_v49 }
 0x175   : > { %1678 = vmatprep.mubr.bf16.mxu1 %v5699_v49 }
 0x17b   : > { %1872 = vmatmul.mubr.bf16.gmra.mrb[48].mxu0 %v5713_v28 }
 0x17c   : > { %1679 = vmatmul.mubr.bf16.gmra.mrb[48].mxu1 %v5713_v28  ;;  %1881 = vmatprep.mubr.bf16.mxu0 %v5727_v1 }
 0x17d   : > { %1688 = vmatprep.mubr.bf16.mxu1 %v5727_v1 }
 0x183   : > { %1882 = vmatmul.mubr.bf16.gmra.mrb[52].mxu0 %v5745_v44 }
 0x184   : > { %1689 = vmatmul.mubr.bf16.gmra.mrb[52].mxu1 %v5745_v44  ;;  %1891 = vmatprep.mubr.bf16.mxu0 %v5759_v37 }
 0x185   : > { %1698 = vmatprep.mubr.bf16.mxu1 %v5759_v37 }
 0x18b   : > { %1892 = vmatmul.mubr.bf16.gmra.mrb[56].mxu0 %v5773_v13 }
 0x18c   : > { %1699 = vmatmul.mubr.bf16.gmra.mrb[56].mxu1 %v5773_v13  ;;  %1901 = vmatprep.mubr.bf16.mxu0 %v5782_v26 }
 0x18d   : > { %1708 = vmatprep.mubr.bf16.mxu1 %v5782_v26 }
 0x193   : > { %1902 = vmatmul.mubr.bf16.gmra.mrb[60].mxu0 %v819_v61 }
 0x194   : > { %1709 = vmatmul.mubr.bf16.gmra.mrb[60].mxu1 %v819_v61  ;;  %1911 = vmatprep.mubr.bf16.mxu0 %v5587_v50 }
 0x195   : > { %1718 = vmatprep.mubr.bf16.mxu1 %v5587_v50 }
 0x19b   : > { %1912 = vmatmul.mubr.bf16.gmra.mrb[64].mxu0 %v5590_v15 }
 0x19c   : > { %1719 = vmatmul.mubr.bf16.gmra.mrb[64].mxu1 %v5590_v15  ;;  %1921 = vmatprep.mubr.bf16.mxu0 %v5619_v29 }
 0x19d   : > { %1728 = vmatprep.mubr.bf16.mxu1 %v5619_v29 }
 0x1a3   : > { %1922 = vmatmul.mubr.bf16.gmra.mrb[68].mxu0 %v5629_v25 }
 0x1a4   : > { %1729 = vmatmul.mubr.bf16.gmra.mrb[68].mxu1 %v5629_v25  ;;  %1931 = vmatprep.mubr.bf16.mxu0 %v5645_v51 }
 0x1a5   : > { %1738 = vmatprep.mubr.bf16.mxu1 %v5645_v51 }
 0x1ab   : > { %1932 = vmatmul.mubr.bf16.gmra.mrb[72].mxu0 %v5655_v35 }
 0x1ac   : > { %1739 = vmatmul.mubr.bf16.gmra.mrb[72].mxu1 %v5655_v35  ;;  %1941 = vmatprep.mubr.bf16.mxu0 %v5675_v62 }
 0x1ad   : > { %1748 = vmatprep.mubr.bf16.mxu1 %v5675_v62 }
 0x1b3   : > { %1942 = vmatmul.mubr.bf16.gmra.mrb[76].mxu0 %v5683_v52 }
 0x1b4   : > { %1749 = vmatmul.mubr.bf16.gmra.mrb[76].mxu1 %v5683_v52  ;;  %1951 = vmatprep.mubr.bf16.mxu0 %v5706_v32 }
 0x1b5   : > { %1758 = vmatprep.mubr.bf16.mxu1 %v5706_v32 }
 0x1bb   : > { %1952 = vmatmul.mubr.bf16.gmra.mrb[80].mxu0 %v5718_v63 }
 0x1bc   : > { %1759 = vmatmul.mubr.bf16.gmra.mrb[80].mxu1 %v5718_v63  ;;  %1961 = vmatprep.mubr.bf16.mxu0 %v5736_v17 }
 0x1bd   : > { %1768 = vmatprep.mubr.bf16.mxu1 %v5736_v17 }
 0x1c3   : > { %1962 = vmatmul.mubr.bf16.gmra.mrb[84].mxu0 %v5749_v11 }
 0x1c4   : > { %1769 = vmatmul.mubr.bf16.gmra.mrb[84].mxu1 %v5749_v11  ;;  %1971 = vmatprep.mubr.bf16.mxu0 %v5767_v42 }
 0x1c5   : > { %1778 = vmatprep.mubr.bf16.mxu1 %v5767_v42 }
 0x1cb   : > { %1972 = vmatmul.mubr.bf16.gmra.mrb[88].mxu0 %v5777_v22 }
 0x1cc   : > { %1779 = vmatmul.mubr.bf16.gmra.mrb[88].mxu1 %v5777_v22  ;;  %1981 = vmatprep.mubr.bf16.mxu0 %v5795_v12 }
 0x1cd   : > { %1788 = vmatprep.mubr.bf16.mxu1 %v5795_v12 }
 0x1d3   : > { %1982 = vmatmul.mubr.bf16.gmra.mrb[92].mxu0 %v5798_v21 }
 0x1d4   : > { %1789 = vmatmul.mubr.bf16.gmra.mrb[92].mxu1 %v5798_v21 }
 0x1ec   : > { %v1527_v50 = vpop.f32.mrb[0].mxu1 }
 0x1ed   : > { %v1447_v15 = vpop.f32.mrb[0].mxu0  ;;  %v1529_v4 = vpop.f32.mrb[1].mxu1  ;;  %v2008_v47 = vmul.f32 0.088388346, %v1527_v50 }
 0x1ee   : > { %v1992_v23 = vmul.f32 0.088388346, %v1447_v15  ;;  %v1449_v29 = vpop.f32.mrb[1].mxu0  ;;  %v1531_v24 = vpop.f32.mrb[2].mxu1  ;;  %v2520_v25 = vmul.f32 0.088388346, %v1529_v4 }
 0x1ef   : > { %v1451_v20 = vpop.f32.mrb[2].mxu0  ;;  %v2009_v51 = vmul.f32 0.088388346, %v1531_v24  ;;  %v1533_v46 = vpop.f32.mrb[3].mxu1  ;;  %v2504_v56 = vmul.f32 0.088388346, %v1449_v29 }
 0x1f0   : > { %v1993_v35 = vmul.f32 0.088388346, %v1451_v20  ;;  %v1453_v39 = vpop.f32.mrb[3].mxu0  ;;  %v2521_v62 = vmul.f32 0.088388346, %v1533_v46 }
 0x1f1   : > { %v3985_v52 = vpack.c.bf16 %v2009_v51, %v2008_v47  ;;  %v2505_v49 = vmul.f32 0.088388346, %v1453_v39 }
 0x1f2   : > { %v3945_v32 = vpack.c.bf16 %v1993_v35, %v1992_v23  ;;  %v4225_v28 = vpack.c.bf16 %v2521_v62, %v2520_v25 }
 0x1f3   : > { %4429 = vst [vmem:[%s5864_s28 + $0x40] sm:$0xff] %v3985_v52   ;;  %v4185_v63 = vpack.c.bf16 %v2505_v49, %v2504_v56 }
 0x1f4   : > { %3946 = vst [vmem:[%s5864_s28] sm:$0xff] %v3945_v32   ;;  %4475 = vst [vmem:[%s5864_s28 + $0xc0] sm:$0xff] %v4225_v28  }
 0x1f5   : > { %4467 = vst [vmem:[%s5864_s28 + $0x80] sm:$0xff] %v4185_v63   ;;  %v1457_v1 = vpop.f32.mrb[4].mxu0 }
 0x1f6   : > { %v1459_v17 = vpop.f32.mrb[5].mxu0  ;;  %v1994_v37 = vmul.f32 0.088388346, %v1457_v1 }
 0x1f7   : > { %v1537_v44 = vpop.f32.mrb[4].mxu1  ;;  %v1461_v11 = vpop.f32.mrb[6].mxu0  ;;  %v2506_v10 = vmul.f32 0.088388346, %v1459_v17 }
 0x1f8   : > { %v1539_v42 = vpop.f32.mrb[5].mxu1  ;;  %v1995_v57 = vmul.f32 0.088388346, %v1461_v11  ;;  %v1463_v31 = vpop.f32.mrb[7].mxu0  ;;  %v2010_v8 = vmul.f32 0.088388346, %v1537_v44 }
 0x1f9   : > { %v1541_v27 = vpop.f32.mrb[6].mxu1  ;;  %v2507_v13 = vmul.f32 0.088388346, %v1463_v31  ;;  %v2522_v16 = vmul.f32 0.088388346, %v1539_v42 }
 0x1fa   : > { %v3950_v7 = vpack.c.bf16 %v1995_v57, %v1994_v37  ;;  %v2011_v33 = vmul.f32 0.088388346, %v1541_v27  ;;  %v1543_v22 = vpop.f32.mrb[7].mxu1 }
 0x1fb   : > { %v4190_v6 = vpack.c.bf16 %v2507_v13, %v2506_v10  ;;  %v2523_v59 = vmul.f32 0.088388346, %v1543_v22 }
 0x1fc   : > { %4422 = vst [vmem:[%s5864_s28 + $0x8] sm:$0xff] %v3950_v7   ;;  %v3990_v9 = vpack.c.bf16 %v2011_v33, %v2010_v8 }
 0x1fd   : > { %4468 = vst [vmem:[%s5864_s28 + $0x88] sm:$0xff] %v4190_v6   ;;  %v4230_v48 = vpack.c.bf16 %v2523_v59, %v2522_v16  ;;  %v1467_v26 = vpop.f32.mrb[8].mxu0 }
 0x1fe   : > { %4430 = vst [vmem:[%s5864_s28 + $0x48] sm:$0xff] %v3990_v9   ;;  %v1469_v30 = vpop.f32.mrb[9].mxu0  ;;  %v1996_v14 = vmul.f32 0.088388346, %v1467_v26 }
 0x1ff   : > { %4476 = vst [vmem:[%s5864_s28 + $0xc8] sm:$0xff] %v4230_v48   ;;  %v1547_v53 = vpop.f32.mrb[8].mxu1  ;;  %v1471_v45 = vpop.f32.mrb[10].mxu0  ;;  %v2508_v34 = vmul.f32 0.088388346, %v1469_v30 }
 0x200   : > { %v1549_v3 = vpop.f32.mrb[9].mxu1  ;;  %v1997_v58 = vmul.f32 0.088388346, %v1471_v45  ;;  %v1473_v40 = vpop.f32.mrb[11].mxu0  ;;  %v2012_v5 = vmul.f32 0.088388346, %v1547_v53 }
 0x201   : > { %v1551_v19 = vpop.f32.mrb[10].mxu1  ;;  %v2509_v60 = vmul.f32 0.088388346, %v1473_v40  ;;  %v2524_v12 = vmul.f32 0.088388346, %v1549_v3 }
 0x202   : > { %v3955_v41 = vpack.c.bf16 %v1997_v58, %v1996_v14  ;;  %v2013_v2 = vmul.f32 0.088388346, %v1551_v19  ;;  %v1553_v55 = vpop.f32.mrb[11].mxu1 }
 0x203   : > { %v4195_v18 = vpack.c.bf16 %v2509_v60, %v2508_v34  ;;  %v2525_v0 = vmul.f32 0.088388346, %v1553_v55 }
 0x204   : > { %4423 = vst [vmem:[%s5864_s28 + $0x10] sm:$0xff] %v3955_v41   ;;  %v3995_v38 = vpack.c.bf16 %v2013_v2, %v2012_v5 }
 0x205   : > { %4469 = vst [vmem:[%s5864_s28 + $0x90] sm:$0xff] %v4195_v18   ;;  %v4235_v21 = vpack.c.bf16 %v2525_v0, %v2524_v12  ;;  %v1477_v61 = vpop.f32.mrb[12].mxu0 }
 0x206   : > { %4431 = vst [vmem:[%s5864_s28 + $0x50] sm:$0xff] %v3995_v38   ;;  %v1479_v36 = vpop.f32.mrb[13].mxu0  ;;  %v1998_v43 = vmul.f32 0.088388346, %v1477_v61 }
 0x207   : > { %4477 = vst [vmem:[%s5864_s28 + $0xd0] sm:$0xff] %v4235_v21   ;;  %v1557_v54 = vpop.f32.mrb[12].mxu1  ;;  %v1481_v4 = vpop.f32.mrb[14].mxu0  ;;  %v2510_v23 = vmul.f32 0.088388346, %v1479_v36 }
 0x208   : > { %v2014_v50 = vmul.f32 0.088388346, %v1557_v54  ;;  %v1559_v15 = vpop.f32.mrb[13].mxu1  ;;  %v1999_v47 = vmul.f32 0.088388346, %v1481_v4  ;;  %v1483_v24 = vpop.f32.mrb[15].mxu0 }
 0x209   : > { %v1561_v29 = vpop.f32.mrb[14].mxu1  ;;  %v2511_v20 = vmul.f32 0.088388346, %v1483_v24  ;;  %v2526_v46 = vmul.f32 0.088388346, %v1559_v15 }
 0x20a   : > { %v2015_v25 = vmul.f32 0.088388346, %v1561_v29  ;;  %v1563_v51 = vpop.f32.mrb[15].mxu1  ;;  %v3960_v35 = vpack.c.bf16 %v1999_v47, %v1998_v43 }
 0x20b   : > { %v2527_v39 = vmul.f32 0.088388346, %v1563_v51  ;;  %v4200_v56 = vpack.c.bf16 %v2511_v20, %v2510_v23 }
 0x20c   : > { %v4000_v62 = vpack.c.bf16 %v2015_v25, %v2014_v50  ;;  %4424 = vst [vmem:[%s5864_s28 + $0x18] sm:$0xff] %v3960_v35  }
 0x20d   : > { %v4240_v52 = vpack.c.bf16 %v2527_v39, %v2526_v46  ;;  %4470 = vst [vmem:[%s5864_s28 + $0x98] sm:$0xff] %v4200_v56   ;;  %v1487_v49 = vpop.f32.mrb[16].mxu0 }
 0x20e   : > { %4432 = vst [vmem:[%s5864_s28 + $0x58] sm:$0xff] %v4000_v62   ;;  %v1489_v28 = vpop.f32.mrb[17].mxu0  ;;  %v2000_v63 = vmul.f32 0.088388346, %v1487_v49 }
 0x20f   : > { %4478 = vst [vmem:[%s5864_s28 + $0xd8] sm:$0xff] %v4240_v52   ;;  %v1567_v32 = vpop.f32.mrb[16].mxu1  ;;  %v1491_v44 = vpop.f32.mrb[18].mxu0  ;;  %v2512_v11 = vmul.f32 0.088388346, %v1489_v28 }
 0x210   : > { %v2016_v1 = vmul.f32 0.088388346, %v1567_v32  ;;  %v1569_v17 = vpop.f32.mrb[17].mxu1  ;;  %v2001_v37 = vmul.f32 0.088388346, %v1491_v44  ;;  %v1493_v57 = vpop.f32.mrb[19].mxu0 }
 0x211   : > { %v1571_v42 = vpop.f32.mrb[18].mxu1  ;;  %v2513_v10 = vmul.f32 0.088388346, %v1493_v57  ;;  %v2528_v13 = vmul.f32 0.088388346, %v1569_v17 }
 0x212   : > { %v2017_v31 = vmul.f32 0.088388346, %v1571_v42  ;;  %v1573_v27 = vpop.f32.mrb[19].mxu1  ;;  %v3965_v8 = vpack.c.bf16 %v2001_v37, %v2000_v63 }
 0x213   : > { %v2529_v7 = vmul.f32 0.088388346, %v1573_v27  ;;  %v4205_v22 = vpack.c.bf16 %v2513_v10, %v2512_v11 }
 0x214   : > { %v4005_v33 = vpack.c.bf16 %v2017_v31, %v2016_v1  ;;  %4425 = vst [vmem:[%s5864_s28 + $0x20] sm:$0xff] %v3965_v8  }
 0x215   : > { %v4245_v16 = vpack.c.bf16 %v2529_v7, %v2528_v13  ;;  %4471 = vst [vmem:[%s5864_s28 + $0xa0] sm:$0xff] %v4205_v22  }
 0x216   : > { %4433 = vst [vmem:[%s5864_s28 + $0x60] sm:$0xff] %v4005_v33   ;;  %v1497_v6 = vpop.f32.mrb[20].mxu0 }
 0x217   : > { %4479 = vst [vmem:[%s5864_s28 + $0xe0] sm:$0xff] %v4245_v16   ;;  %v1577_v59 = vpop.f32.mrb[20].mxu1  ;;  %v1499_v9 = vpop.f32.mrb[21].mxu0  ;;  %v2002_v48 = vmul.f32 0.088388346, %v1497_v6 }
 0x218   : > { %v2018_v26 = vmul.f32 0.088388346, %v1577_v59  ;;  %v1579_v30 = vpop.f32.mrb[21].mxu1  ;;  %v1501_v53 = vpop.f32.mrb[22].mxu0  ;;  %v2514_v45 = vmul.f32 0.088388346, %v1499_v9 }
 0x219   : > { %v2003_v14 = vmul.f32 0.088388346, %v1501_v53  ;;  %v1581_v3 = vpop.f32.mrb[22].mxu1  ;;  %v1503_v58 = vpop.f32.mrb[23].mxu0  ;;  %v2530_v60 = vmul.f32 0.088388346, %v1579_v30 }
 0x21a   : > { %v2019_v40 = vmul.f32 0.088388346, %v1581_v3  ;;  %v2515_v34 = vmul.f32 0.088388346, %v1503_v58  ;;  %v1583_v19 = vpop.f32.mrb[23].mxu1 }
 0x21b   : > { %v3970_v5 = vpack.c.bf16 %v2003_v14, %v2002_v48  ;;  %v2531_v41 = vmul.f32 0.088388346, %v1583_v19 }
 0x21c   : > { %v4010_v2 = vpack.c.bf16 %v2019_v40, %v2018_v26  ;;  %v4210_v55 = vpack.c.bf16 %v2515_v34, %v2514_v45 }
 0x21d   : > { %4426 = vst [vmem:[%s5864_s28 + $0x28] sm:$0xff] %v3970_v5   ;;  %v4250_v12 = vpack.c.bf16 %v2531_v41, %v2530_v60 }
 0x21e   : > { %4434 = vst [vmem:[%s5864_s28 + $0x68] sm:$0xff] %v4010_v2   ;;  %4472 = vst [vmem:[%s5864_s28 + $0xa8] sm:$0xff] %v4210_v55   ;;  %v1507_v18 = vpop.f32.mrb[24].mxu0 }
 0x21f   : > { %4480 = vst [vmem:[%s5864_s28 + $0xe8] sm:$0xff] %v4250_v12   ;;  %v1587_v0 = vpop.f32.mrb[24].mxu1  ;;  %v1509_v38 = vpop.f32.mrb[25].mxu0  ;;  %v2004_v21 = vmul.f32 0.088388346, %v1507_v18 }
 0x220   : > { %v2020_v61 = vmul.f32 0.088388346, %v1587_v0  ;;  %v1589_v54 = vpop.f32.mrb[25].mxu1  ;;  %v1511_v36 = vpop.f32.mrb[26].mxu0  ;;  %v2516_v43 = vmul.f32 0.088388346, %v1509_v38 }
 0x221   : > { %v2005_v50 = vmul.f32 0.088388346, %v1511_v36  ;;  %v1591_v15 = vpop.f32.mrb[26].mxu1  ;;  %v1513_v4 = vpop.f32.mrb[27].mxu0  ;;  %v2532_v24 = vmul.f32 0.088388346, %v1589_v54 }
 0x222   : > { %v2021_v23 = vmul.f32 0.088388346, %v1591_v15  ;;  %v2517_v47 = vmul.f32 0.088388346, %v1513_v4  ;;  %v1593_v29 = vpop.f32.mrb[27].mxu1 }
 0x223   : > { %v3975_v25 = vpack.c.bf16 %v2005_v50, %v2004_v21  ;;  %v2533_v20 = vmul.f32 0.088388346, %v1593_v29 }
 0x224   : > { %v4015_v51 = vpack.c.bf16 %v2021_v23, %v2020_v61  ;;  %v4215_v46 = vpack.c.bf16 %v2517_v47, %v2516_v43 }
 0x225   : > { %4427 = vst [vmem:[%s5864_s28 + $0x30] sm:$0xff] %v3975_v25   ;;  %v4255_v35 = vpack.c.bf16 %v2533_v20, %v2532_v24 }
 0x226   : > { %4435 = vst [vmem:[%s5864_s28 + $0x70] sm:$0xff] %v4015_v51   ;;  %4473 = vst [vmem:[%s5864_s28 + $0xb0] sm:$0xff] %v4215_v46   ;;  %v1517_v39 = vpop.f32.mrb[28].mxu0 }
 0x227   : > { %4481 = vst [vmem:[%s5864_s28 + $0xf0] sm:$0xff] %v4255_v35   ;;  %v1597_v62 = vpop.f32.mrb[28].mxu1  ;;  %v1519_v56 = vpop.f32.mrb[29].mxu0  ;;  %v2006_v52 = vmul.f32 0.088388346, %v1517_v39 }
 0x228   : > { %v2022_v49 = vmul.f32 0.088388346, %v1597_v62  ;;  %v1599_v32 = vpop.f32.mrb[29].mxu1  ;;  %v1521_v28 = vpop.f32.mrb[30].mxu0  ;;  %v2518_v63 = vmul.f32 0.088388346, %v1519_v56 }
 0x229   : > { %v2007_v1 = vmul.f32 0.088388346, %v1521_v28  ;;  %v1601_v17 = vpop.f32.mrb[30].mxu1  ;;  %v1523_v44 = vpop.f32.mrb[31].mxu0  ;;  %v2534_v57 = vmul.f32 0.088388346, %v1599_v32 }
 0x22a   : > { %v2023_v11 = vmul.f32 0.088388346, %v1601_v17  ;;  %v2519_v37 = vmul.f32 0.088388346, %v1523_v44  ;;  %v1603_v42 = vpop.f32.mrb[31].mxu1 }
 0x22b   : > { %v3980_v31 = vpack.c.bf16 %v2007_v1, %v2006_v52  ;;  %v2535_v10 = vmul.f32 0.088388346, %v1603_v42 }
 0x22c   : > { %v4020_v27 = vpack.c.bf16 %v2023_v11, %v2022_v49  ;;  %v4220_v13 = vpack.c.bf16 %v2519_v37, %v2518_v63 }
 0x22d   : > { %4428 = vst [vmem:[%s5864_s28 + $0x38] sm:$0xff] %v3980_v31   ;;  %v4260_v8 = vpack.c.bf16 %v2535_v10, %v2534_v57 }
 0x22e   : > { %4436 = vst [vmem:[%s5864_s28 + $0x78] sm:$0xff] %v4020_v27   ;;  %4474 = vst [vmem:[%s5864_s28 + $0xb8] sm:$0xff] %v4220_v13   ;;  %v1833_v7 = vpop.f32.mrb[32].mxu0 }
 0x22f   : > { %4482 = vst [vmem:[%s5864_s28 + $0xf8] sm:$0xff] %v4260_v8   ;;  %v1640_v33 = vpop.f32.mrb[32].mxu1  ;;  %v1835_v22 = vpop.f32.mrb[33].mxu0 }
 0x230   : > { %v1642_v16 = vpop.f32.mrb[33].mxu1  ;;  %v1837_v6 = vpop.f32.mrb[34].mxu0 }
 0x231   : > { %v1644_v59 = vpop.f32.mrb[34].mxu1  ;;  %v4105_v9 = vpack.c.bf16 %v1837_v6, %v1833_v7  ;;  %v1839_v48 = vpop.f32.mrb[35].mxu0 }
 0x232   : > { %v4025_v26 = vpack.c.bf16 %v1644_v59, %v1640_v33  ;;  %v1646_v30 = vpop.f32.mrb[35].mxu1  ;;  %v4345_v53 = vpack.c.bf16 %v1839_v48, %v1835_v22 }
 0x233   : > { %4106 = vst [vmem:[%s5900_s14] sm:$0xff] %v4105_v9   ;;  %v4265_v45 = vpack.c.bf16 %v1646_v30, %v1642_v16 }
 0x234   : > { %4026 = vst [vmem:[%s5904_s27] sm:$0xff] %v4025_v26   ;;  %4499 = vst [vmem:[%s5900_s14 + $0x80] sm:$0xff] %v4345_v53  }
 0x235   : > { %4483 = vst [vmem:[%s5904_s27 + $0x80] sm:$0xff] %v4265_v45  }
 0x236   : > { %v1843_v14 = vpop.f32.mrb[36].mxu0 }
 0x237   : > { %v1650_v3 = vpop.f32.mrb[36].mxu1  ;;  %v1845_v58 = vpop.f32.mrb[37].mxu0 }
 0x238   : > { %v1652_v40 = vpop.f32.mrb[37].mxu1  ;;  %v1847_v34 = vpop.f32.mrb[38].mxu0 }
 0x239   : > { %v1654_v19 = vpop.f32.mrb[38].mxu1  ;;  %v4110_v60 = vpack.c.bf16 %v1847_v34, %v1843_v14  ;;  %v1849_v5 = vpop.f32.mrb[39].mxu0 }
 0x23a   : > { %v4030_v41 = vpack.c.bf16 %v1654_v19, %v1650_v3  ;;  %v1656_v2 = vpop.f32.mrb[39].mxu1  ;;  %v4350_v55 = vpack.c.bf16 %v1849_v5, %v1845_v58 }
 0x23b   : > { %4452 = vst [vmem:[%s5900_s14 + $0x8] sm:$0xff] %v4110_v60   ;;  %v4270_v12 = vpack.c.bf16 %v1656_v2, %v1652_v40 }
 0x23c   : > { %4437 = vst [vmem:[%s5904_s27 + $0x8] sm:$0xff] %v4030_v41   ;;  %4500 = vst [vmem:[%s5900_s14 + $0x88] sm:$0xff] %v4350_v55  }
 0x23d   : > { %4484 = vst [vmem:[%s5904_s27 + $0x88] sm:$0xff] %v4270_v12  }
 0x23e   : > { %v1853_v18 = vpop.f32.mrb[40].mxu0 }
 0x23f   : > { %v1660_v0 = vpop.f32.mrb[40].mxu1  ;;  %v1855_v38 = vpop.f32.mrb[41].mxu0 }
 0x240   : > { %v1662_v21 = vpop.f32.mrb[41].mxu1  ;;  %v1857_v61 = vpop.f32.mrb[42].mxu0 }
 0x241   : > { %v1664_v54 = vpop.f32.mrb[42].mxu1  ;;  %v4115_v36 = vpack.c.bf16 %v1857_v61, %v1853_v18  ;;  %v1859_v43 = vpop.f32.mrb[43].mxu0 }
 0x242   : > { %v4035_v50 = vpack.c.bf16 %v1664_v54, %v1660_v0  ;;  %v1666_v15 = vpop.f32.mrb[43].mxu1  ;;  %v4355_v4 = vpack.c.bf16 %v1859_v43, %v1855_v38 }
 0x243   : > { %4453 = vst [vmem:[%s5900_s14 + $0x10] sm:$0xff] %v4115_v36   ;;  %v4275_v23 = vpack.c.bf16 %v1666_v15, %v1662_v21 }
 0x244   : > { %4438 = vst [vmem:[%s5904_s27 + $0x10] sm:$0xff] %v4035_v50   ;;  %4501 = vst [vmem:[%s5900_s14 + $0x90] sm:$0xff] %v4355_v4  }
 0x245   : > { %4485 = vst [vmem:[%s5904_s27 + $0x90] sm:$0xff] %v4275_v23  }
 0x246   : > { %v1863_v47 = vpop.f32.mrb[44].mxu0 }
 0x247   : > { %v1670_v29 = vpop.f32.mrb[44].mxu1  ;;  %v1865_v24 = vpop.f32.mrb[45].mxu0 }
 0x248   : > { %v1672_v25 = vpop.f32.mrb[45].mxu1  ;;  %v1867_v20 = vpop.f32.mrb[46].mxu0 }
 0x249   : > { %v1674_v51 = vpop.f32.mrb[46].mxu1  ;;  %v4120_v46 = vpack.c.bf16 %v1867_v20, %v1863_v47  ;;  %v1869_v35 = vpop.f32.mrb[47].mxu0 }
 0x24a   : > { %v4040_v39 = vpack.c.bf16 %v1674_v51, %v1670_v29  ;;  %v1676_v62 = vpop.f32.mrb[47].mxu1  ;;  %v4360_v56 = vpack.c.bf16 %v1869_v35, %v1865_v24 }
 0x24b   : > { %4454 = vst [vmem:[%s5900_s14 + $0x18] sm:$0xff] %v4120_v46   ;;  %v4280_v52 = vpack.c.bf16 %v1676_v62, %v1672_v25 }
 0x24c   : > { %4439 = vst [vmem:[%s5904_s27 + $0x18] sm:$0xff] %v4040_v39   ;;  %4502 = vst [vmem:[%s5900_s14 + $0x98] sm:$0xff] %v4360_v56  }
 0x24d   : > { %4486 = vst [vmem:[%s5904_s27 + $0x98] sm:$0xff] %v4280_v52  }
 0x24e   : > { %v1873_v49 = vpop.f32.mrb[48].mxu0 }
 0x24f   : > { %v1680_v32 = vpop.f32.mrb[48].mxu1  ;;  %v1875_v28 = vpop.f32.mrb[49].mxu0 }
 0x250   : > { %v1682_v63 = vpop.f32.mrb[49].mxu1  ;;  %v1877_v1 = vpop.f32.mrb[50].mxu0 }
 0x251   : > { %v1684_v17 = vpop.f32.mrb[50].mxu1  ;;  %v4125_v44 = vpack.c.bf16 %v1877_v1, %v1873_v49  ;;  %v1879_v11 = vpop.f32.mrb[51].mxu0 }
 0x252   : > { %v4045_v37 = vpack.c.bf16 %v1684_v17, %v1680_v32  ;;  %v1686_v42 = vpop.f32.mrb[51].mxu1  ;;  %v4365_v57 = vpack.c.bf16 %v1879_v11, %v1875_v28 }
 0x253   : > { %4455 = vst [vmem:[%s5900_s14 + $0x20] sm:$0xff] %v4125_v44   ;;  %v4285_v31 = vpack.c.bf16 %v1686_v42, %v1682_v63 }
 0x254   : > { %4440 = vst [vmem:[%s5904_s27 + $0x20] sm:$0xff] %v4045_v37   ;;  %4503 = vst [vmem:[%s5900_s14 + $0xa0] sm:$0xff] %v4365_v57  }
 0x255   : > { %4487 = vst [vmem:[%s5904_s27 + $0xa0] sm:$0xff] %v4285_v31  }
 0x256   : > { %v1883_v10 = vpop.f32.mrb[52].mxu0 }
 0x257   : > { %v1690_v27 = vpop.f32.mrb[52].mxu1  ;;  %v1885_v13 = vpop.f32.mrb[53].mxu0 }
 0x258   : > { %v1692_v8 = vpop.f32.mrb[53].mxu1  ;;  %v1887_v7 = vpop.f32.mrb[54].mxu0 }
 0x259   : > { %v1694_v33 = vpop.f32.mrb[54].mxu1  ;;  %v4130_v22 = vpack.c.bf16 %v1887_v7, %v1883_v10  ;;  %v1889_v16 = vpop.f32.mrb[55].mxu0 }
 0x25a   : > { %v4050_v6 = vpack.c.bf16 %v1694_v33, %v1690_v27  ;;  %v1696_v59 = vpop.f32.mrb[55].mxu1  ;;  %v4370_v9 = vpack.c.bf16 %v1889_v16, %v1885_v13 }
 0x25b   : > { %4456 = vst [vmem:[%s5900_s14 + $0x28] sm:$0xff] %v4130_v22   ;;  %v4290_v48 = vpack.c.bf16 %v1696_v59, %v1692_v8 }
 0x25c   : > { %4441 = vst [vmem:[%s5904_s27 + $0x28] sm:$0xff] %v4050_v6   ;;  %4504 = vst [vmem:[%s5900_s14 + $0xa8] sm:$0xff] %v4370_v9  }
 0x25d   : > { %4488 = vst [vmem:[%s5904_s27 + $0xa8] sm:$0xff] %v4290_v48  }
 0x25e   : > { %v1893_v26 = vpop.f32.mrb[56].mxu0 }
 0x25f   : > { %v1700_v30 = vpop.f32.mrb[56].mxu1  ;;  %v1895_v53 = vpop.f32.mrb[57].mxu0 }
 0x260   : > { %v1702_v45 = vpop.f32.mrb[57].mxu1  ;;  %v1897_v14 = vpop.f32.mrb[58].mxu0 }
 0x261   : > { %v1704_v3 = vpop.f32.mrb[58].mxu1  ;;  %v4135_v58 = vpack.c.bf16 %v1897_v14, %v1893_v26  ;;  %v1899_v40 = vpop.f32.mrb[59].mxu0 }
 0x262   : > { %v4055_v34 = vpack.c.bf16 %v1704_v3, %v1700_v30  ;;  %v1706_v19 = vpop.f32.mrb[59].mxu1  ;;  %v4375_v60 = vpack.c.bf16 %v1899_v40, %v1895_v53 }
 0x263   : > { %4457 = vst [vmem:[%s5900_s14 + $0x30] sm:$0xff] %v4135_v58   ;;  %v4295_v5 = vpack.c.bf16 %v1706_v19, %v1702_v45 }
 0x264   : > { %4442 = vst [vmem:[%s5904_s27 + $0x30] sm:$0xff] %v4055_v34   ;;  %4505 = vst [vmem:[%s5900_s14 + $0xb0] sm:$0xff] %v4375_v60  }
 0x265   : > { %4489 = vst [vmem:[%s5904_s27 + $0xb0] sm:$0xff] %v4295_v5  }
 0x266   : > { %v1903_v41 = vpop.f32.mrb[60].mxu0 }
 0x267   : > { %v1710_v2 = vpop.f32.mrb[60].mxu1  ;;  %v1905_v55 = vpop.f32.mrb[61].mxu0 }
 0x268   : > { %v1712_v12 = vpop.f32.mrb[61].mxu1  ;;  %v1907_v18 = vpop.f32.mrb[62].mxu0 }
 0x269   : > { %v1714_v0 = vpop.f32.mrb[62].mxu1  ;;  %v4140_v38 = vpack.c.bf16 %v1907_v18, %v1903_v41  ;;  %v1909_v21 = vpop.f32.mrb[63].mxu0 }
 0x26a   : > { %v4060_v61 = vpack.c.bf16 %v1714_v0, %v1710_v2  ;;  %v1716_v54 = vpop.f32.mrb[63].mxu1  ;;  %v4380_v36 = vpack.c.bf16 %v1909_v21, %v1905_v55 }
 0x26b   : > { %4458 = vst [vmem:[%s5900_s14 + $0x38] sm:$0xff] %v4140_v38   ;;  %v4300_v43 = vpack.c.bf16 %v1716_v54, %v1712_v12 }
 0x26c   : > { %4443 = vst [vmem:[%s5904_s27 + $0x38] sm:$0xff] %v4060_v61   ;;  %4506 = vst [vmem:[%s5900_s14 + $0xb8] sm:$0xff] %v4380_v36  }
 0x26d   : > { %4490 = vst [vmem:[%s5904_s27 + $0xb8] sm:$0xff] %v4300_v43  }
 0x26e   : > { %v1913_v50 = vpop.f32.mrb[64].mxu0 }
 0x26f   : > { %v1720_v15 = vpop.f32.mrb[64].mxu1  ;;  %v1915_v4 = vpop.f32.mrb[65].mxu0 }
 0x270   : > { %v1722_v23 = vpop.f32.mrb[65].mxu1  ;;  %v1917_v47 = vpop.f32.mrb[66].mxu0 }
 0x271   : > { %v1724_v29 = vpop.f32.mrb[66].mxu1  ;;  %v4145_v24 = vpack.c.bf16 %v1917_v47, %v1913_v50  ;;  %v1919_v25 = vpop.f32.mrb[67].mxu0 }
 0x272   : > { %v4065_v20 = vpack.c.bf16 %v1724_v29, %v1720_v15  ;;  %v1726_v51 = vpop.f32.mrb[67].mxu1  ;;  %v4385_v46 = vpack.c.bf16 %v1919_v25, %v1915_v4 }
 0x273   : > { %4459 = vst [vmem:[%s5900_s14 + $0x40] sm:$0xff] %v4145_v24   ;;  %v4305_v35 = vpack.c.bf16 %v1726_v51, %v1722_v23 }
 0x274   : > { %4444 = vst [vmem:[%s5904_s27 + $0x40] sm:$0xff] %v4065_v20   ;;  %4507 = vst [vmem:[%s5900_s14 + $0xc0] sm:$0xff] %v4385_v46  }
 0x275   : > { %4491 = vst [vmem:[%s5904_s27 + $0xc0] sm:$0xff] %v4305_v35  }
 0x276   : > { %v1923_v39 = vpop.f32.mrb[68].mxu0 }
 0x277   : > { %v1730_v62 = vpop.f32.mrb[68].mxu1  ;;  %v1925_v56 = vpop.f32.mrb[69].mxu0 }
 0x278   : > { %v1732_v52 = vpop.f32.mrb[69].mxu1  ;;  %v1927_v49 = vpop.f32.mrb[70].mxu0 }
 0x279   : > { %v1734_v32 = vpop.f32.mrb[70].mxu1  ;;  %v4150_v28 = vpack.c.bf16 %v1927_v49, %v1923_v39  ;;  %v1929_v63 = vpop.f32.mrb[71].mxu0 }
 0x27a   : > { %v4070_v1 = vpack.c.bf16 %v1734_v32, %v1730_v62  ;;  %v1736_v17 = vpop.f32.mrb[71].mxu1  ;;  %v4390_v44 = vpack.c.bf16 %v1929_v63, %v1925_v56 }
 0x27b   : > { %4460 = vst [vmem:[%s5900_s14 + $0x48] sm:$0xff] %v4150_v28   ;;  %v4310_v11 = vpack.c.bf16 %v1736_v17, %v1732_v52 }
 0x27c   : > { %4445 = vst [vmem:[%s5904_s27 + $0x48] sm:$0xff] %v4070_v1   ;;  %4508 = vst [vmem:[%s5900_s14 + $0xc8] sm:$0xff] %v4390_v44  }
 0x27d   : > { %4492 = vst [vmem:[%s5904_s27 + $0xc8] sm:$0xff] %v4310_v11  }
 0x27e   : > { %v1933_v37 = vpop.f32.mrb[72].mxu0 }
 0x27f   : > { %v1740_v42 = vpop.f32.mrb[72].mxu1  ;;  %v1935_v57 = vpop.f32.mrb[73].mxu0 }
 0x280   : > { %v1742_v31 = vpop.f32.mrb[73].mxu1  ;;  %v1937_v10 = vpop.f32.mrb[74].mxu0 }
 0x281   : > { %v1744_v27 = vpop.f32.mrb[74].mxu1  ;;  %v4155_v13 = vpack.c.bf16 %v1937_v10, %v1933_v37  ;;  %v1939_v8 = vpop.f32.mrb[75].mxu0 }
 0x282   : > { %v4075_v7 = vpack.c.bf16 %v1744_v27, %v1740_v42  ;;  %v1746_v33 = vpop.f32.mrb[75].mxu1  ;;  %v4395_v22 = vpack.c.bf16 %v1939_v8, %v1935_v57 }
 0x283   : > { %4461 = vst [vmem:[%s5900_s14 + $0x50] sm:$0xff] %v4155_v13   ;;  %v4315_v16 = vpack.c.bf16 %v1746_v33, %v1742_v31 }
 0x284   : > { %4446 = vst [vmem:[%s5904_s27 + $0x50] sm:$0xff] %v4075_v7   ;;  %4509 = vst [vmem:[%s5900_s14 + $0xd0] sm:$0xff] %v4395_v22  }
 0x285   : > { %4493 = vst [vmem:[%s5904_s27 + $0xd0] sm:$0xff] %v4315_v16  }
 0x286   : > { %v1943_v6 = vpop.f32.mrb[76].mxu0 }
 0x287   : > { %v1750_v59 = vpop.f32.mrb[76].mxu1  ;;  %v1945_v9 = vpop.f32.mrb[77].mxu0 }
 0x288   : > { %v1752_v48 = vpop.f32.mrb[77].mxu1  ;;  %v1947_v26 = vpop.f32.mrb[78].mxu0 }
 0x289   : > { %v1754_v30 = vpop.f32.mrb[78].mxu1  ;;  %v4160_v53 = vpack.c.bf16 %v1947_v26, %v1943_v6  ;;  %v1949_v45 = vpop.f32.mrb[79].mxu0 }
 0x28a   : > { %v4080_v14 = vpack.c.bf16 %v1754_v30, %v1750_v59  ;;  %v1756_v3 = vpop.f32.mrb[79].mxu1  ;;  %v4400_v58 = vpack.c.bf16 %v1949_v45, %v1945_v9 }
 0x28b   : > { %4462 = vst [vmem:[%s5900_s14 + $0x58] sm:$0xff] %v4160_v53   ;;  %v4320_v40 = vpack.c.bf16 %v1756_v3, %v1752_v48 }
 0x28c   : > { %4447 = vst [vmem:[%s5904_s27 + $0x58] sm:$0xff] %v4080_v14   ;;  %4510 = vst [vmem:[%s5900_s14 + $0xd8] sm:$0xff] %v4400_v58  }
 0x28d   : > { %4494 = vst [vmem:[%s5904_s27 + $0xd8] sm:$0xff] %v4320_v40  }
 0x28e   : > { %v1953_v34 = vpop.f32.mrb[80].mxu0 }
 0x28f   : > { %v1760_v19 = vpop.f32.mrb[80].mxu1  ;;  %v1955_v60 = vpop.f32.mrb[81].mxu0 }
 0x290   : > { %v1762_v5 = vpop.f32.mrb[81].mxu1  ;;  %v1957_v41 = vpop.f32.mrb[82].mxu0 }
 0x291   : > { %v1764_v2 = vpop.f32.mrb[82].mxu1  ;;  %v4165_v55 = vpack.c.bf16 %v1957_v41, %v1953_v34  ;;  %v1959_v12 = vpop.f32.mrb[83].mxu0 }
 0x292   : > { %v4085_v18 = vpack.c.bf16 %v1764_v2, %v1760_v19  ;;  %v1766_v0 = vpop.f32.mrb[83].mxu1  ;;  %v4405_v38 = vpack.c.bf16 %v1959_v12, %v1955_v60 }
 0x293   : > { %4463 = vst [vmem:[%s5900_s14 + $0x60] sm:$0xff] %v4165_v55   ;;  %v4325_v21 = vpack.c.bf16 %v1766_v0, %v1762_v5 }
 0x294   : > { %4448 = vst [vmem:[%s5904_s27 + $0x60] sm:$0xff] %v4085_v18   ;;  %4511 = vst [vmem:[%s5900_s14 + $0xe0] sm:$0xff] %v4405_v38  }
 0x295   : > { %4495 = vst [vmem:[%s5904_s27 + $0xe0] sm:$0xff] %v4325_v21  }
 0x296   : > { %v1963_v61 = vpop.f32.mrb[84].mxu0 }
 0x297   : > { %v1770_v54 = vpop.f32.mrb[84].mxu1  ;;  %v1965_v36 = vpop.f32.mrb[85].mxu0 }
 0x298   : > { %v1772_v43 = vpop.f32.mrb[85].mxu1  ;;  %v1967_v50 = vpop.f32.mrb[86].mxu0 }
 0x299   : > { %v1774_v15 = vpop.f32.mrb[86].mxu1  ;;  %v4170_v4 = vpack.c.bf16 %v1967_v50, %v1963_v61  ;;  %v1969_v23 = vpop.f32.mrb[87].mxu0 }
 0x29a   : > { %v4090_v47 = vpack.c.bf16 %v1774_v15, %v1770_v54  ;;  %v1776_v29 = vpop.f32.mrb[87].mxu1  ;;  %v4410_v24 = vpack.c.bf16 %v1969_v23, %v1965_v36 }
 0x29b   : > { %4464 = vst [vmem:[%s5900_s14 + $0x68] sm:$0xff] %v4170_v4   ;;  %v4330_v25 = vpack.c.bf16 %v1776_v29, %v1772_v43 }
 0x29c   : > { %4449 = vst [vmem:[%s5904_s27 + $0x68] sm:$0xff] %v4090_v47   ;;  %4512 = vst [vmem:[%s5900_s14 + $0xe8] sm:$0xff] %v4410_v24  }
 0x29d   : > { %4496 = vst [vmem:[%s5904_s27 + $0xe8] sm:$0xff] %v4330_v25  }
 0x29e   : > { %v1973_v20 = vpop.f32.mrb[88].mxu0 }
 0x29f   : > { %v1780_v51 = vpop.f32.mrb[88].mxu1  ;;  %v1975_v46 = vpop.f32.mrb[89].mxu0 }
 0x2a0   : > { %v1782_v35 = vpop.f32.mrb[89].mxu1  ;;  %v1977_v39 = vpop.f32.mrb[90].mxu0 }
 0x2a1   : > { %v1784_v62 = vpop.f32.mrb[90].mxu1  ;;  %v4175_v56 = vpack.c.bf16 %v1977_v39, %v1973_v20  ;;  %v1979_v52 = vpop.f32.mrb[91].mxu0 }
 0x2a2   : > { %v4095_v49 = vpack.c.bf16 %v1784_v62, %v1780_v51  ;;  %v1786_v32 = vpop.f32.mrb[91].mxu1  ;;  %v4415_v28 = vpack.c.bf16 %v1979_v52, %v1975_v46 }
 0x2a3   : > { %4465 = vst [vmem:[%s5900_s14 + $0x70] sm:$0xff] %v4175_v56   ;;  %v4335_v63 = vpack.c.bf16 %v1786_v32, %v1782_v35 }
 0x2a4   : > { %4450 = vst [vmem:[%s5904_s27 + $0x70] sm:$0xff] %v4095_v49   ;;  %4513 = vst [vmem:[%s5900_s14 + $0xf0] sm:$0xff] %v4415_v28  }
 0x2a5   : > { %4497 = vst [vmem:[%s5904_s27 + $0xf0] sm:$0xff] %v4335_v63  }
 0x2a6   : > { %v1983_v1 = vpop.f32.mrb[92].mxu0 }
 0x2a7   : > { %v1790_v17 = vpop.f32.mrb[92].mxu1  ;;  %v1985_v44 = vpop.f32.mrb[93].mxu0 }
 0x2a8   : > { %v1792_v11 = vpop.f32.mrb[93].mxu1  ;;  %v1987_v37 = vpop.f32.mrb[94].mxu0 }
 0x2a9   : > { %v1794_v42 = vpop.f32.mrb[94].mxu1  ;;  %v4180_v57 = vpack.c.bf16 %v1987_v37, %v1983_v1  ;;  %v1989_v31 = vpop.f32.mrb[95].mxu0 }
 0x2aa   : > { %v4100_v10 = vpack.c.bf16 %v1794_v42, %v1790_v17  ;;  %v1796_v27 = vpop.f32.mrb[95].mxu1  ;;  %v4420_v13 = vpack.c.bf16 %v1989_v31, %v1985_v44 }
 0x2ab   : > { %4466 = vst [vmem:[%s5900_s14 + $0x78] sm:$0xff] %v4180_v57   ;;  %v4340_v8 = vpack.c.bf16 %v1796_v27, %v1792_v11 }
 0x2ac   : > { %4451 = vst [vmem:[%s5904_s27 + $0x78] sm:$0xff] %v4100_v10   ;;  %4514 = vst [vmem:[%s5900_s14 + $0xf8] sm:$0xff] %v4420_v13  }
 0x2ad   : > { %4498 = vst [vmem:[%s5904_s27 + $0xf8] sm:$0xff] %v4340_v8  }
 0x2ae   : > { %s3738_s15 = sshll.u32 %s5017_s21, 5  ;;  %s3739_s16 = sshll.u32 %s5021_s22, 7 }
 0x2af   : > { %s3042_s17 = sadd.s32 %s3739_s16, %s3738_s15  ;;  %s3061_s6 = sshll.u32 %s5864_s28, 4  ;;  %s3062_s6 = int_to_ptr.vmem [resolvable:$true] %s3061_s6 }
 0x2b0   : > { %s5977_s9 = sshll.u32 %s3042_s17, 6  ;;  %s5041_s13 = smov 2048  }
 0x2b1   : > { %s3044_s29 = scalar_lea.hbm %s6070_s3, %s5977_s9  ;;  %4553 = sst [smem:[#allocation12]] (%p5195_p11), %s5041_s13 }
 0x2b2   : > { %s5042_s23 = smov 4096   ;;  %s5043_s21 = smov 32  }
 0x2b3   : > { %4554 = sst [smem:[#allocation12 + $0x1]] (%p5195_p11), %s5042_s23  ;;  %s5044_s22 = smov 64  }
 0x2b4   : > { %4555 = sst [smem:[#allocation12 + $0x2]] (%p5195_p11), %s5043_s21  ;;  %s5045_s12 = smov 4  }
 0x2b5   : > { %4556 = sst [smem:[#allocation12 + $0x3]] (%p5195_p11), %s5044_s22  ;;  %s5046_s2 = smov [#allocation11]  }
 0x2b6   : > { %4557 = sst [smem:[#allocation12 + $0x4]] (%p5195_p11), %s5044_s22  ;;  %s5047_s5 = smov 0  }
 0x2b7   : > { %4558 = sst [smem:[#allocation12 + $0x5]] (%p5195_p11), %s5045_s12 }
 0x2b8   : > { %4559 = dma.general (%p5195_p11), %s3062_s6, 4096, %s3044_s29, %s3020_s18, %s5046_s2, [#allocation12], %s5047_s5, 0  }
 0x2b9   : > { %s3091_s15 = scalar_lea.hbm %s6071_s4, %s5977_s9  ;;  %s3108_s16 = sshll.u32 %s5904_s27, 4  ;;  %s3109_s16 = int_to_ptr.vmem [resolvable:$true] %s3108_s16 }
 0x2ba   : > { %s5048_s17 = smov 2048   ;;  %s5049_s18 = smov 4096  }
 0x2bb   : > { %4560 = sst [smem:[#allocation14]] (%p5195_p11), %s5048_s17  ;;  %s5050_s6 = smov 32  }
 0x2bc   : > { %4561 = sst [smem:[#allocation14 + $0x1]] (%p5195_p11), %s5049_s18  ;;  %s5051_s26 = smov 64  }
 0x2bd   : > { %4562 = sst [smem:[#allocation14 + $0x2]] (%p5195_p11), %s5050_s6  ;;  %s5052_s10 = smov 4  }
 0x2be   : > { %4563 = sst [smem:[#allocation14 + $0x3]] (%p5195_p11), %s5051_s26  ;;  %s5053_s29 = smov [#allocation13]  }
 0x2bf   : > { %4564 = sst [smem:[#allocation14 + $0x4]] (%p5195_p11), %s5051_s26  ;;  %s5054_s27 = smov 0  }
 0x2c0   : > { %4565 = sst [smem:[#allocation14 + $0x5]] (%p5195_p11), %s5052_s10 }
 0x2c1   : > { %4566 = dma.general (%p5195_p11), %s3109_s16, 4096, %s3091_s15, %s5972_s7, %s5053_s29, [#allocation14], %s5054_s27, 0  }
 0x2c2   : > { %s6168_s21 = sld [smem:[#allocation49_spill]]  ;;  %s3155_s12 = sshll.u32 %s5900_s14, 4  ;;  %s3156_s12 = int_to_ptr.vmem [resolvable:$true] %s3155_s12 }
 0x2c3   : > { %s5055_s2 = smov 2048   ;;  %s5056_s5 = smov 4096  }
 0x2c4   : > { %4567 = sst [smem:[#allocation16]] (%p5195_p11), %s5055_s2  ;;  %s5057_s28 = smov 32  }
 0x2c5   : > { %4568 = sst [smem:[#allocation16 + $0x1]] (%p5195_p11), %s5056_s5  ;;  %s5058_s30 = smov 64  }
 0x2c6   : > { %4569 = sst [smem:[#allocation16 + $0x2]] (%p5195_p11), %s5057_s28  ;;  %s5059_s15 = smov 4  }
 0x2c7   : > { %4570 = sst [smem:[#allocation16 + $0x3]] (%p5195_p11), %s5058_s30  ;;  %s5061_s14 = smov 0  }
 0x2c8   : > { %s3138_s22 = scalar_lea.hbm %s6168_s21, %s5977_s9  ;;  %4571 = sst [smem:[#allocation16 + $0x4]] (%p5195_p11), %s5058_s30 }
 0x2c9   : > { %4572 = sst [smem:[#allocation16 + $0x5]] (%p5195_p11), %s5059_s15  ;;  %s5060_s9 = smov [#allocation15]  }
 0x2ca   : > { %4573 = dma.general (%p5195_p11), %s3156_s12, 4096, %s3138_s22, %s5972_s7, %s5060_s9, [#allocation16], %s5061_s14, 0  }
 0x2cb PF: > { %s6169_s16 = sld [smem:[#allocation21_spill]]  ;;  %s6170_s17 = sld [smem:[#allocation23_spill]] }
 0x2cc   : > { %p4598_p8 = scmp.ge.s32.totalorder %s5033_s25, 2 }
 0x2d1   : > { %s3183_s18 = sand.u32 1, %s6169_s16   ;;  %p6171_p10 = scmp.ne.s32.totalorder %s6170_s17, 0 }
 0x2d2   : > { %s3184_s6 = scalar_lea.sflag [#allocation4], %s3183_s18 }
 0x2d3   : > { %p4586_p12 = pnand %p4598_p8, %p6171_p10 }
 0x2d5   : > { %4996 = dma.done.wait (!%p4586_p12), %s3184_s6, 4096  }
 0x2d6   : > { %4998 = vsyncadd (!%p4586_p12), %s3184_s6, 4294963200  ;;  %s6172_s26 = sadd.s32 4294967294, %s5033_s25  }
 0x2d7   : > { %s3192_s10 = sand.u32 1, %s6172_s26  }
 0x2d8   : > { %s3193_s29 = scalar_lea.sflag [#allocation9], %s3192_s10 }
 0x2d9   : > { %5000 = dma.done.wait (!%p4586_p12), %s3193_s29, 8192  }
 0x2da   : > { %5002 = vsyncadd (!%p4586_p12), %s3193_s29, 4294959104  ;;  %s26_s25 = sadd.s32 1, %s5033_s25   ;;  %s6173_s21 = sld [smem:[#allocation22_spill]] }
 0x2db   : > { %p23_p11 = scmp.ge.s32.totalorder %s26_s25, 6   ;;  %s6174_s23 = sld [smem:[#allocation24_spill]] }
 0x2dc   : > { %s6175_s8 = sld [smem:[#allocation25_spill]]  ;;  %s6176_s18 = smov %s5009_s19 }
 0x2dd   : > { %s6177_s19 = smov %s5013_s20  ;;  %s6178_s20 = smov %s5212_s11 }
 0x2de   : > { %s6179_s22 = smov %s5029_s24  ;;  %25 = sbr.rel (!%p23_p11) target bundleno = 13 (0xd), region = 131 }
 0x2e2   : > { %s6180_s24 = smov %s6175_s8 }
 0x2e5   :  { %3207 = vsyncpa [#allocation3], 1 }
 0x2e6   :  { %3209 = vsyncpa [#allocation3 + $0x1], 1 }
 0x2e7   :  { %3210 = vsyncpa [#allocation6], 1 }
 0x2e8   :  { %3211 = vsyncpa [#allocation4], 1 }
 0x2e9   :  { %3213 = vsyncpa [#allocation4 + $0x1], 1 }
 0x2ea   :  { %3214 = vsyncpa [#allocation9], 1 }
 0x2eb   :  { %3216 = vsyncpa [#allocation9 + $0x1], 1 }

</bundles_post_ra>
